<compile_context>
chip_gen: v5e
topology: v5e:2x2
jax: 0.10.0
libtpu: 0.0.40
codegen_flags: <defaults>
</compile_context>

<pallas_src>
import functools

import jax
import jax.numpy as jnp
import numpy as np
from jax.experimental import pallas as pl
from jax.experimental.pallas import tpu as pltpu


def _upsample_kernel(xp_ref, w_ref, b_ref, o_ref, *, th, width, cin):
    # xp_ref: (1, H+2, W+2, Cin) bf16  zero-padded NHWC image (full image per
    #                                  batch element; revolving across row tiles)
    # w_ref : (9, Cin, 4*Cout)   bf16  tap-major packed weights
    #                                  (tap = 3*dy+dx, col = co*4 + 2*r + s)
    # b_ref : (1, 4*Cout)        f32
    # o_ref : (1, TH*W, 4*Cout)  bf16  rows = y_local*W + x, cols = co*4+2r+s
    row0 = pl.multiple_of(pl.program_id(1) * th, th)

    acc = None
    for dy in range(3):
        for dx in range(3):
            # Shifted (TH, W, Cin) window of the padded input for tap (dy, dx).
            tap = xp_ref[0, pl.ds(row0 + dy, th), pl.ds(dx, width), :]
            # Free relabel when W is a multiple of the sublane tile (W % 8 == 0,
            # asserted in the wrapper).
            tap = tap.reshape(th * width, cin)
            part = jnp.dot(tap, w_ref[3 * dy + dx],
                           preferred_element_type=jnp.float32)
            acc = part if acc is None else acc + part

    o_ref[0] = (acc + b_ref[...]).astype(o_ref.dtype)


def _choose_row_tile(h, width, cout, max_out_block_bytes=8 << 20):
    """Largest row tile whose double-buffered bf16 output block fits the budget,
    preferring >= 2 row tiles so small-batch calls still pipeline and can fill
    both v7x TensorCores.  TODO(synk): per-generation budgets (v5e/v6e have
    128 MiB VMEM and favour larger tiles; v7x has 64 MiB)."""
    divisors = [t for t in range(1, h + 1) if h % t == 0]
    fits = [t for t in divisors
            if 2 * t * width * 4 * cout * 2 <= max_out_block_bytes]
    if not fits:
        return 1
    multi = [t for t in fits if t < h]
    return max(multi) if multi else max(fits)


def upsample(x_nchw, w, b, out_dtype=jnp.float32):
    """ConvTranspose2d(k=4, s=2, p=1).  x: (N,Cin,H,W)  w: (Cin,Cout,4,4)  b: (Cout,)."""
    n, cin, h, width = x_nchw.shape
    cout = w.shape[1]
    assert w.shape == (cin, cout, 4, 4), w.shape
    # TODO(synk): general (non 8-aligned) widths need either padded-W handling
    # or a relayout-tolerant tap reshape.
    assert width % 8 == 0, "kernel assumes W % 8 == 0 (sublane tiling)"
    th = _choose_row_tile(h, width, cout)

    # NCHW -> NHWC + 1px zero pad + bf16 cast: one fused XLA copy of the input.
    xp = jnp.pad(jnp.transpose(x_nchw, (0, 2, 3, 1)).astype(jnp.bfloat16),
                 ((0, 0), (1, 1), (1, 1), (0, 0)))

    # Pack the 4x4 transposed-conv taps as (9, Cin, 4*Cout): output pixel
    # (2i+r, 2j+s) reads input (i+dy-1, j+dx-1) through kernel element
    # (kh, kw) = (r+3-2*dy, s+3-2*dx); combos outside the 4x4 kernel keep 0.
    # TODO(synk): each sub-pixel only touches 4 of the 9 taps (5/9 of the MACs
    # are zeros) -- split into per-sub-pixel K=4*Cin dots once a shape is
    # MXU-bound; at mem-bound shapes the zero padding is free filler.
    wf = w.astype(jnp.float32)
    w9 = jnp.zeros((9, cin, cout, 4), jnp.float32)
    for dy in range(3):
        for dx in range(3):
            for r in range(2):
                for s in range(2):
                    kh = r + 3 - 2 * dy
                    kw = s + 3 - 2 * dx
                    if 0 <= kh <= 3 and 0 <= kw <= 3:
                        w9 = w9.at[3 * dy + dx, :, :, 2 * r + s].set(wf[:, :, kh, kw])
    w9 = w9.reshape(9, cin, 4 * cout).astype(jnp.bfloat16)
    b4 = jnp.repeat(b.astype(jnp.float32), 4).reshape(1, 4 * cout)

    # VMEM budget: double-buffered input + output blocks plus resident weights,
    # capped well below v7x's 64 MiB physical VMEM.
    in_block = (h + 2) * (width + 2) * cin * 2
    out_block = th * width * 4 * cout * 2
    need = 2 * in_block + 2 * out_block + 2 * (9 * cin * 4 * cout * 2) + 2 * (4 * cout * 4)
    vmem_limit = int(min(max(4 * need, 16 << 20), 48 << 20))

    kernel = functools.partial(_upsample_kernel, th=th, width=width, cin=cin)
    out3 = pl.pallas_call(
        kernel,
        out_shape=jax.ShapeDtypeStruct((n, h * width, 4 * cout), jnp.bfloat16),
        grid_spec=pltpu.PrefetchScalarGridSpec(
            num_scalar_prefetch=0,
            grid=(n, h // th),
            in_specs=[
                # Full padded image, indexed by batch only: the row-tile axis is
                # innermost, so the block index is unchanged across row tiles and
                # Pallas skips the re-DMA (revolving buffer).
                # TODO(synk): for very large H*W*Cin switch to a halo'd row-tile
                # input block (pl.Element / manual DMA) so the input block no
                # longer scales with the full image against v7x's 64 MiB VMEM.
                pl.BlockSpec((1, h + 2, width + 2, cin),
                             lambda bn, bt: (bn, 0, 0, 0)),
                # Weights / bias are grid-invariant (resident).
                # TODO(synk): pipeline_mode=pl.Buffered(1) would drop their
                # second buffer at large Cin*Cout.
                pl.BlockSpec((9, cin, 4 * cout), lambda bn, bt: (0, 0, 0)),
                pl.BlockSpec((1, 4 * cout), lambda bn, bt: (0, 0)),
            ],
            out_specs=pl.BlockSpec((1, th * width, 4 * cout),
                                   lambda bn, bt: (bn, bt, 0)),
        ),
        compiler_params=pltpu.CompilerParams(
            dimension_semantics=("parallel", "parallel"),
            vmem_limit_bytes=vmem_limit,
        ),
    )(xp, w9, b4)

    # Sub-pixel de-interleave + conversion to the module's NCHW output layout:
    # one fused reshape/transpose (reads bf16, writes out_dtype).
    # out[n, co, 2i+r, 2j+s] = out3[n, i*W+j, co*4 + 2r + s]
    out = out3.reshape(n, h, width, cout, 2, 2)
    out = jnp.transpose(out, (0, 3, 1, 4, 2, 5)).reshape(n, cout, 2 * h, 2 * width)
    return out.astype(out_dtype)


def upsample_ref(x, w, b):
    # Pure-JAX reference (f32): ConvTranspose2d(k=4,s=2,p=1) == conv with
    # lhs_dilation=2, padding=2, spatially-flipped + channel-transposed kernel.
    rhs = jnp.transpose(w[:, :, ::-1, ::-1], (1, 0, 2, 3))  # (Cout, Cin, 4, 4)
    out = jax.lax.conv_general_dilated(
        x, rhs, window_strides=(1, 1), padding=((2, 2), (2, 2)),
        lhs_dilation=(2, 2), rhs_dilation=(1, 1),
        dimension_numbers=('NCHW', 'OIHW', 'NCHW'))
    return out + b[None, :, None, None]


if __name__ == "__main__":
    key = jax.random.PRNGKey(0)
    k1, k2, k3 = jax.random.split(key, 3)
    N, Cin, Cout, H, W = 2, 4, 4, 16, 16

    x = jax.random.normal(k1, (N, Cin, H, W), jnp.float32)
    # ConvTranspose2d weight layout: (Cin, Cout, 4, 4).
    w = jax.random.normal(k2, (Cin, Cout, 4, 4), jnp.float32) * 0.1
    b = jax.random.normal(k3, (Cout,), jnp.float32) * 0.1

    out = jax.block_until_ready(jax.jit(upsample)(x, w, b))
    ref = jax.block_until_ready(upsample_ref(x, w, b))

    assert out.shape == (N, Cout, 2 * H, 2 * W), out.shape
    # Operands and output are bf16 (f32 accumulation), so compare against the
    # f32 reference with bf16-appropriate tolerance.
    np.testing.assert_allclose(np.asarray(out), np.asarray(ref),
                               rtol=2e-2, atol=3e-2)
    print("KERNEL_OK")
</pallas_src>

<mosaic_0001>
module attributes {stable_mosaic.version = 11 : i64} {
  func.func @_upsample_kernel(%arg0: i32, %arg1: i32, %arg2: memref<1x18x18x4xbf16, #tpu.memory_space<vmem>>, %arg3: memref<9x4x16xbf16, #tpu.memory_space<vmem>>, %arg4: memref<1x16xf32, #tpu.memory_space<vmem>>, %arg5: memref<1x128x16xbf16, #tpu.memory_space<vmem>>) attributes {dimension_semantics = [#tpu.dimension_semantics<parallel>, #tpu.dimension_semantics<parallel>], iteration_bounds = array<i64: 2, 2>, scalar_prefetch = 0 : i64, scratch_operands = 0 : i64, tpu.core_type = #tpu.core_type<tc>, window_params = [{transform_indices = @transform_0, window_bounds = array<i64: 1, 18, 18, 4>}, {pipeline_mode = #tpu.pipeline_mode<synchronous>, transform_indices = @transform_1, window_bounds = array<i64: 9, 4, 16>}, {pipeline_mode = #tpu.pipeline_mode<synchronous>, transform_indices = @transform_2, window_bounds = array<i64: 1, 16>}, {transform_indices = @transform_3, window_bounds = array<i64: 1, 128, 16>}]} {
    %c8_i32 = arith.constant 8 : i32
    %0 = arith.muli %arg1, %c8_i32 : i32
    %1 = tpu.assume_multiple %0, 8 : i32
    %c0_i32 = arith.constant 0 : i32
    %2 = arith.addi %1, %c0_i32 : i32
    %c0 = arith.constant 0 : index
    %3 = arith.index_cast %2 : i32 to index
    %c0_0 = arith.constant 0 : index
    %c0_1 = arith.constant 0 : index
    %4 = vector.load %arg2[%c0, %3, %c0_0, %c0_1] : memref<1x18x18x4xbf16, #tpu.memory_space<vmem>>, vector<1x8x16x4xbf16>
    %5 = vector.shape_cast %4 : vector<1x8x16x4xbf16> to vector<8x16x4xbf16>
    %6 = vector.shape_cast %5 : vector<8x16x4xbf16> to vector<128x4xbf16>
    %c0_2 = arith.constant 0 : index
    %c0_3 = arith.constant 0 : index
    %c0_4 = arith.constant 0 : index
    %7 = vector.load %arg3[%c0_2, %c0_3, %c0_4] : memref<9x4x16xbf16, #tpu.memory_space<vmem>>, vector<1x4x16xbf16>
    %8 = vector.shape_cast %7 : vector<1x4x16xbf16> to vector<4x16xbf16>
    %cst = arith.constant dense<0.000000e+00> : vector<128x16xf32>
    %9 = tpu.matmul %6, %8, %cst {dimension_numbers = #tpu.dot_dimension_numbers<[1], [0], [0], [1], [0, 0, 1, 1], [], []>} : vector<128x4xbf16>, vector<4x16xbf16>, vector<128x16xf32> -> vector<128x16xf32>
    %c0_i32_5 = arith.constant 0 : i32
    %10 = arith.addi %1, %c0_i32_5 : i32
    %c0_6 = arith.constant 0 : index
    %11 = arith.index_cast %10 : i32 to index
    %c1 = arith.constant 1 : index
    %c0_7 = arith.constant 0 : index
    %12 = vector.load %arg2[%c0_6, %11, %c1, %c0_7] : memref<1x18x18x4xbf16, #tpu.memory_space<vmem>>, vector<1x8x16x4xbf16>
    %13 = vector.shape_cast %12 : vector<1x8x16x4xbf16> to vector<8x16x4xbf16>
    %14 = vector.shape_cast %13 : vector<8x16x4xbf16> to vector<128x4xbf16>
    %c1_8 = arith.constant 1 : index
    %c0_9 = arith.constant 0 : index
    %c0_10 = arith.constant 0 : index
    %15 = vector.load %arg3[%c1_8, %c0_9, %c0_10] : memref<9x4x16xbf16, #tpu.memory_space<vmem>>, vector<1x4x16xbf16>
    %16 = vector.shape_cast %15 : vector<1x4x16xbf16> to vector<4x16xbf16>
    %cst_11 = arith.constant dense<0.000000e+00> : vector<128x16xf32>
    %17 = tpu.matmul %14, %16, %cst_11 {dimension_numbers = #tpu.dot_dimension_numbers<[1], [0], [0], [1], [0, 0, 1, 1], [], []>} : vector<128x4xbf16>, vector<4x16xbf16>, vector<128x16xf32> -> vector<128x16xf32>
    %18 = arith.addf %9, %17 : vector<128x16xf32>
    %c0_i32_12 = arith.constant 0 : i32
    %19 = arith.addi %1, %c0_i32_12 : i32
    %c0_13 = arith.constant 0 : index
    %20 = arith.index_cast %19 : i32 to index
    %c2 = arith.constant 2 : index
    %c0_14 = arith.constant 0 : index
    %21 = vector.load %arg2[%c0_13, %20, %c2, %c0_14] : memref<1x18x18x4xbf16, #tpu.memory_space<vmem>>, vector<1x8x16x4xbf16>
    %22 = vector.shape_cast %21 : vector<1x8x16x4xbf16> to vector<8x16x4xbf16>
    %23 = vector.shape_cast %22 : vector<8x16x4xbf16> to vector<128x4xbf16>
    %c2_15 = arith.constant 2 : index
    %c0_16 = arith.constant 0 : index
    %c0_17 = arith.constant 0 : index
    %24 = vector.load %arg3[%c2_15, %c0_16, %c0_17] : memref<9x4x16xbf16, #tpu.memory_space<vmem>>, vector<1x4x16xbf16>
    %25 = vector.shape_cast %24 : vector<1x4x16xbf16> to vector<4x16xbf16>
    %cst_18 = arith.constant dense<0.000000e+00> : vector<128x16xf32>
    %26 = tpu.matmul %23, %25, %cst_18 {dimension_numbers = #tpu.dot_dimension_numbers<[1], [0], [0], [1], [0, 0, 1, 1], [], []>} : vector<128x4xbf16>, vector<4x16xbf16>, vector<128x16xf32> -> vector<128x16xf32>
    %27 = arith.addf %18, %26 : vector<128x16xf32>
    %c1_i32 = arith.constant 1 : i32
    %28 = arith.addi %1, %c1_i32 : i32
    %c0_19 = arith.constant 0 : index
    %29 = arith.index_cast %28 : i32 to index
    %c0_20 = arith.constant 0 : index
    %c0_21 = arith.constant 0 : index
    %30 = vector.load %arg2[%c0_19, %29, %c0_20, %c0_21] : memref<1x18x18x4xbf16, #tpu.memory_space<vmem>>, vector<1x8x16x4xbf16>
    %31 = vector.shape_cast %30 : vector<1x8x16x4xbf16> to vector<8x16x4xbf16>
    %32 = vector.shape_cast %31 : vector<8x16x4xbf16> to vector<128x4xbf16>
    %c3 = arith.constant 3 : index
    %c0_22 = arith.constant 0 : index
    %c0_23 = arith.constant 0 : index
    %33 = vector.load %arg3[%c3, %c0_22, %c0_23] : memref<9x4x16xbf16, #tpu.memory_space<vmem>>, vector<1x4x16xbf16>
    %34 = vector.shape_cast %33 : vector<1x4x16xbf16> to vector<4x16xbf16>
    %cst_24 = arith.constant dense<0.000000e+00> : vector<128x16xf32>
    %35 = tpu.matmul %32, %34, %cst_24 {dimension_numbers = #tpu.dot_dimension_numbers<[1], [0], [0], [1], [0, 0, 1, 1], [], []>} : vector<128x4xbf16>, vector<4x16xbf16>, vector<128x16xf32> -> vector<128x16xf32>
    %36 = arith.addf %27, %35 : vector<128x16xf32>
    %c1_i32_25 = arith.constant 1 : i32
    %37 = arith.addi %1, %c1_i32_25 : i32
    %c0_26 = arith.constant 0 : index
    %38 = arith.index_cast %37 : i32 to index
    %c1_27 = arith.constant 1 : index
    %c0_28 = arith.constant 0 : index
    %39 = vector.load %arg2[%c0_26, %38, %c1_27, %c0_28] : memref<1x18x18x4xbf16, #tpu.memory_space<vmem>>, vector<1x8x16x4xbf16>
    %40 = vector.shape_cast %39 : vector<1x8x16x4xbf16> to vector<8x16x4xbf16>
    %41 = vector.shape_cast %40 : vector<8x16x4xbf16> to vector<128x4xbf16>
    %c4 = arith.constant 4 : index
    %c0_29 = arith.constant 0 : index
    %c0_30 = arith.constant 0 : index
    %42 = vector.load %arg3[%c4, %c0_29, %c0_30] : memref<9x4x16xbf16, #tpu.memory_space<vmem>>, vector<1x4x16xbf16>
    %43 = vector.shape_cast %42 : vector<1x4x16xbf16> to vector<4x16xbf16>
    %cst_31 = arith.constant dense<0.000000e+00> : vector<128x16xf32>
    %44 = tpu.matmul %41, %43, %cst_31 {dimension_numbers = #tpu.dot_dimension_numbers<[1], [0], [0], [1], [0, 0, 1, 1], [], []>} : vector<128x4xbf16>, vector<4x16xbf16>, vector<128x16xf32> -> vector<128x16xf32>
    %45 = arith.addf %36, %44 : vector<128x16xf32>
    %c1_i32_32 = arith.constant 1 : i32
    %46 = arith.addi %1, %c1_i32_32 : i32
    %c0_33 = arith.constant 0 : index
    %47 = arith.index_cast %46 : i32 to index
    %c2_34 = arith.constant 2 : index
    %c0_35 = arith.constant 0 : index
    %48 = vector.load %arg2[%c0_33, %47, %c2_34, %c0_35] : memref<1x18x18x4xbf16, #tpu.memory_space<vmem>>, vector<1x8x16x4xbf16>
    %49 = vector.shape_cast %48 : vector<1x8x16x4xbf16> to vector<8x16x4xbf16>
    %50 = vector.shape_cast %49 : vector<8x16x4xbf16> to vector<128x4xbf16>
    %c5 = arith.constant 5 : index
    %c0_36 = arith.constant 0 : index
    %c0_37 = arith.constant 0 : index
    %51 = vector.load %arg3[%c5, %c0_36, %c0_37] : memref<9x4x16xbf16, #tpu.memory_space<vmem>>, vector<1x4x16xbf16>
    %52 = vector.shape_cast %51 : vector<1x4x16xbf16> to vector<4x16xbf16>
    %cst_38 = arith.constant dense<0.000000e+00> : vector<128x16xf32>
    %53 = tpu.matmul %50, %52, %cst_38 {dimension_numbers = #tpu.dot_dimension_numbers<[1], [0], [0], [1], [0, 0, 1, 1], [], []>} : vector<128x4xbf16>, vector<4x16xbf16>, vector<128x16xf32> -> vector<128x16xf32>
    %54 = arith.addf %45, %53 : vector<128x16xf32>
    %c2_i32 = arith.constant 2 : i32
    %55 = arith.addi %1, %c2_i32 : i32
    %c0_39 = arith.constant 0 : index
    %56 = arith.index_cast %55 : i32 to index
    %c0_40 = arith.constant 0 : index
    %c0_41 = arith.constant 0 : index
    %57 = vector.load %arg2[%c0_39, %56, %c0_40, %c0_41] : memref<1x18x18x4xbf16, #tpu.memory_space<vmem>>, vector<1x8x16x4xbf16>
    %58 = vector.shape_cast %57 : vector<1x8x16x4xbf16> to vector<8x16x4xbf16>
    %59 = vector.shape_cast %58 : vector<8x16x4xbf16> to vector<128x4xbf16>
    %c6 = arith.constant 6 : index
    %c0_42 = arith.constant 0 : index
    %c0_43 = arith.constant 0 : index
    %60 = vector.load %arg3[%c6, %c0_42, %c0_43] : memref<9x4x16xbf16, #tpu.memory_space<vmem>>, vector<1x4x16xbf16>
    %61 = vector.shape_cast %60 : vector<1x4x16xbf16> to vector<4x16xbf16>
    %cst_44 = arith.constant dense<0.000000e+00> : vector<128x16xf32>
    %62 = tpu.matmul %59, %61, %cst_44 {dimension_numbers = #tpu.dot_dimension_numbers<[1], [0], [0], [1], [0, 0, 1, 1], [], []>} : vector<128x4xbf16>, vector<4x16xbf16>, vector<128x16xf32> -> vector<128x16xf32>
    %63 = arith.addf %54, %62 : vector<128x16xf32>
    %c2_i32_45 = arith.constant 2 : i32
    %64 = arith.addi %1, %c2_i32_45 : i32
    %c0_46 = arith.constant 0 : index
    %65 = arith.index_cast %64 : i32 to index
    %c1_47 = arith.constant 1 : index
    %c0_48 = arith.constant 0 : index
    %66 = vector.load %arg2[%c0_46, %65, %c1_47, %c0_48] : memref<1x18x18x4xbf16, #tpu.memory_space<vmem>>, vector<1x8x16x4xbf16>
    %67 = vector.shape_cast %66 : vector<1x8x16x4xbf16> to vector<8x16x4xbf16>
    %68 = vector.shape_cast %67 : vector<8x16x4xbf16> to vector<128x4xbf16>
    %c7 = arith.constant 7 : index
    %c0_49 = arith.constant 0 : index
    %c0_50 = arith.constant 0 : index
    %69 = vector.load %arg3[%c7, %c0_49, %c0_50] : memref<9x4x16xbf16, #tpu.memory_space<vmem>>, vector<1x4x16xbf16>
    %70 = vector.shape_cast %69 : vector<1x4x16xbf16> to vector<4x16xbf16>
    %cst_51 = arith.constant dense<0.000000e+00> : vector<128x16xf32>
    %71 = tpu.matmul %68, %70, %cst_51 {dimension_numbers = #tpu.dot_dimension_numbers<[1], [0], [0], [1], [0, 0, 1, 1], [], []>} : vector<128x4xbf16>, vector<4x16xbf16>, vector<128x16xf32> -> vector<128x16xf32>
    %72 = arith.addf %63, %71 : vector<128x16xf32>
    %c2_i32_52 = arith.constant 2 : i32
    %73 = arith.addi %1, %c2_i32_52 : i32
    %c0_53 = arith.constant 0 : index
    %74 = arith.index_cast %73 : i32 to index
    %c2_54 = arith.constant 2 : index
    %c0_55 = arith.constant 0 : index
    %75 = vector.load %arg2[%c0_53, %74, %c2_54, %c0_55] : memref<1x18x18x4xbf16, #tpu.memory_space<vmem>>, vector<1x8x16x4xbf16>
    %76 = vector.shape_cast %75 : vector<1x8x16x4xbf16> to vector<8x16x4xbf16>
    %77 = vector.shape_cast %76 : vector<8x16x4xbf16> to vector<128x4xbf16>
    %c8 = arith.constant 8 : index
    %c0_56 = arith.constant 0 : index
    %c0_57 = arith.constant 0 : index
    %78 = vector.load %arg3[%c8, %c0_56, %c0_57] : memref<9x4x16xbf16, #tpu.memory_space<vmem>>, vector<1x4x16xbf16>
    %79 = vector.shape_cast %78 : vector<1x4x16xbf16> to vector<4x16xbf16>
    %cst_58 = arith.constant dense<0.000000e+00> : vector<128x16xf32>
    %80 = tpu.matmul %77, %79, %cst_58 {dimension_numbers = #tpu.dot_dimension_numbers<[1], [0], [0], [1], [0, 0, 1, 1], [], []>} : vector<128x4xbf16>, vector<4x16xbf16>, vector<128x16xf32> -> vector<128x16xf32>
    %81 = arith.addf %72, %80 : vector<128x16xf32>
    %c0_59 = arith.constant 0 : index
    %c0_60 = arith.constant 0 : index
    %82 = vector.load %arg4[%c0_59, %c0_60] : memref<1x16xf32, #tpu.memory_space<vmem>>, vector<1x16xf32>
    %83 = vector.broadcast %82 : vector<1x16xf32> to vector<128x16xf32>
    %84 = arith.addf %81, %83 : vector<128x16xf32>
    %85 = arith.truncf %84 : vector<128x16xf32> to vector<128x16xbf16>
    %c0_61 = arith.constant 0 : index
    %c0_62 = arith.constant 0 : index
    %c0_63 = arith.constant 0 : index
    %86 = vector.load %arg5[%c0_61, %c0_62, %c0_63] : memref<1x128x16xbf16, #tpu.memory_space<vmem>>, vector<1x128x16xbf16>
    %87 = vector.shape_cast %86 : vector<1x128x16xbf16> to vector<128x16xbf16>
    %88 = vector.shape_cast %85 : vector<128x16xbf16> to vector<1x128x16xbf16>
    tpu.vector_store %arg5[%c0_61, %c0_62, %c0_63], %88 {strides = array<i32>} : memref<1x128x16xbf16, #tpu.memory_space<vmem>>, vector<1x128x16xbf16>,
    return
  }
  func.func @transform_0(%arg0: i32, %arg1: i32) -> (i32, i32, i32, i32) {
    %c0_i32 = arith.constant 0 : i32
    %c0_i32_0 = arith.constant 0 : i32
    %c0_i32_1 = arith.constant 0 : i32
    %c0_i32_2 = arith.constant 0 : i32
    return %arg0, %c0_i32, %c0_i32_0, %c0_i32_1 : i32, i32, i32, i32
  }
  func.func @transform_1(%arg0: i32, %arg1: i32) -> (i32, i32, i32) {
    %c0_i32 = arith.constant 0 : i32
    %c0_i32_0 = arith.constant 0 : i32
    %c0_i32_1 = arith.constant 0 : i32
    %c0_i32_2 = arith.constant 0 : i32
    return %c0_i32, %c0_i32_0, %c0_i32_1 : i32, i32, i32
  }
  func.func @transform_2(%arg0: i32, %arg1: i32) -> (i32, i32) {
    %c0_i32 = arith.constant 0 : i32
    %c0_i32_0 = arith.constant 0 : i32
    %c0_i32_1 = arith.constant 0 : i32
    return %c0_i32, %c0_i32_0 : i32, i32
  }
  func.func @transform_3(%arg0: i32, %arg1: i32) -> (i32, i32, i32) {
    %c0_i32 = arith.constant 0 : i32
    %c0_i32_0 = arith.constant 0 : i32
    return %arg0, %arg1, %c0_i32 : i32, i32, i32
  }
}

</mosaic_0001>

<bundles_post_ra>
// kernel: upsample.1
= control target key start
LH: loop header
LB: loop body
LE: loop exit
PB: predicated region body
PF: predicated region fallthrough
CT: control target
= control target key end

     0   :  { %s2819_s12 = smov 0   ;;  %s2821_s13 = smov 0   ;;  %s3668_s0 = inlined_call_operand.vmem [shape: bf16[2,18,18,4], index: 0, kind: input, shape index: {}]   ;;  %s3669_s1 = inlined_call_operand.vmem [shape: bf16[9,4,16], index: 1, kind: input, shape index: {}]   ;;  %s3670_s2 = inlined_call_operand.vmem [shape: f32[1,16], index: 2, kind: input, shape index: {}]   ;;  %s3671_s3 = inlined_call_operand.vmem [shape: bf16[2,256,16], index: 3, kind: output, shape index: {}]  }
   0x1   :  { %s2823_s14 = smov 0   ;;  %s2825_s15 = smov 0  }
   0x2   :  { %s2827_s16 = smov 0  }
   0x3 LB: > { %s22_s17 = sadd.s32 1, %s2789_s14  ;;  %s25_s18 = sadd.s32 1, %s2793_s15  ;;  %s2797_s16 = sphi %s2827_s16, %s13_s16   ;;  %s2793_s15 = sphi %s2825_s15, %s3679_s15   ;;  %s2789_s14 = sphi %s2823_s14, %s3678_s14   ;;  %s2785_s13 = sphi %s2821_s13, %s3677_s13   ;;  %s2781_s12 = sphi %s2819_s12, %s3676_s12  }
   0x4   : > { %p23_p0 = scmp.ge.s32.totalorder %s22_s17, 2  ;;  %p2379_p1 = scmp.ge.s32.totalorder %s2797_s16, 1 }
   0x5   : > { %p151_p2 = scmp.lt.s32.totalorder %s2797_s16, 5 }
   0x6   : > { %s3681_s17 = smov (%p23_p0, %s22_s17), 0  ;;  %s3683_s18 = smov (!%p23_p0, %s25_s18), %s2793_s15 }
   0x7   : > { %p152_p3 = pnand %p2379_p1, %p151_p2  ;;  %p27_p4 = scmp.ge.s32.totalorder %s3683_s18, 2 }
   0x8   : > { %p179_p5 = scmp.lt.s32.totalorder (!%p152_p3), %s2785_s13, 1  ;;  %s2689_s23 = smul.u32 (!%p152_p3), 96, %s2781_s12 }
   0x9   : > { %s3685_s18 = smov (%p27_p4, %s3683_s18), 0  ;;  %155 = sbr.rel (%p152_p3) target bundleno = 466 (0x1d2), region = 32 }
   0xe   : > { %v2387_v0 = vld [vmem:[%s3669_s1 + $0x2] sm:$0x3]  ;;  %vm470_vm0 = vcmask 1041408   ;;  %s3687_s13 = smov (!%p179_p5, %s2785_s13), 1  ;;  %v2444_v2 = vld [vmem:[%s3669_s1 + $0x4] sm:$0x3] }
   0xf   : > { %v472_v1 = vsel %vm470_vm0, %v2387_v0, 0  ;;  %v773_v3 = vsel %vm470_vm0, %v2444_v2, 0  ;;  %s2717_s24 = smul.u32 216, %s3687_s13  ;;  %v2471_v4 = vld [vmem:[%s3669_s1 + $0x6] sm:$0x3]  ;;  %vm445_vm3 = vcmask 31744  }
  0x10   : > { %2714 = vmatpush.bf16.msra.mxu1 %v472_v1  ;;  %2715 = vmatpush.bf16.msra.mxu2 %v472_v1  ;;  %v215_v5 = vld [vmem:[%s3669_s1] sm:$0x3]  ;;  %v927_v6 = vsel %vm470_vm0, %v2471_v4, 0  ;;  %v2536_v8 = vld [vmem:[%s3669_s1 + $0x8] sm:$0x3]  ;;  %vm663_vm5 = vcmask 1042432  }
  0x11   : > { %2716 = vmatpush.bf16.msra.mxu3 %v472_v1  ;;  %481 = vmatpush.bf16.msra.mxu0 %v472_v1  ;;  %v588_v7 = vsel %vm470_vm0, %v215_v5, 0  ;;  %s183_s6 = scalar_lea.vmem %s3668_s0, %s2717_s24  ;;  %v1261_v9 = vsel %vm470_vm0, %v2536_v8, 0  ;;  %vm224_vm1 = vsmask.f32 3328  ;;  %vm225_vm2 = vsmask.f32 7440 }
  0x12   : > { %s2878_s7 = scalar_lea.vmem %s183_s6, %s2689_s23  ;;  %vm2906_vm4 = vmor %vm224_vm1, %vm225_vm2  ;;  %vm664_vm6 = vcmask 1046532   ;;  %s2381_s23 = sshll.u32 %s2781_s12, 4  ;;  %vm2264_vm8 = vcmask 125952  }
  0x13   : > { %v203_v10 = vld [vmem:[%s2878_s7 + $0x18] sm:$0xf]  ;;  %v2882_v11 = vld [vmem:[%s2878_s7 + $0x1c] sm:$0xf]  ;;  %v2885_v12 = vld [vmem:[%s2878_s7 + $0x20] sm:$0x1] }
  0x14   : > { %782 = vmatpush.bf16.msrb.mxu2 %v773_v3  ;;  %597 = vmatpush.bf16.msrb.mxu1 %v588_v7  ;;  %v276_v13 = vshrl.u32 %v203_v10, 16  ;;  %v279_v14 = vshll.u32 %v203_v10, 16  ;;  %v285_v15 = vshll.u32 %v2882_v11, 16  ;;  %v289_v16 = vshrl.u32 %v2882_v11, 16  ;;  %v207_v17 = vld [vmem:[%s2878_s7 + $0x30] sm:$0xf]  ;;  %vm3014_vm7 = vmor %vm663_vm5, %vm664_vm6 }
  0x15   : > { %936 = vmatpush.bf16.msrb.mxu3 %v927_v6  ;;  %1270 = vmatpush.bf16.msrb.mxu0 %v1261_v9  ;;  %v295_v18 = vshll.u32 %v2885_v12, 16  ;;  %v2892_v19 = vld [vmem:[%s2878_s7 + $0x34] sm:$0xf]  ;;  %v2895_v20 = vld [vmem:[%s2878_s7 + $0x38] sm:$0x1]  ;;  %v324_v21 = vshrl.u32 %v207_v17, 16 }
  0x16   : > { %v278_v22 = vrot.slane %v276_v13, 4  ;;  %v281_v23 = vrot.slane %v279_v14, 5  ;;  %v287_v24 = vrot.slane %v285_v15, 5  ;;  %v291_v25 = vrot.slane %v289_v16, 4  ;;  %v211_v26 = vld [vmem:[%s2878_s7 + $0x48] sm:$0xf] }
  0x17   : > { %v297_v27 = vrot.slane %v295_v18, 5  ;;  %v326_v28 = vrot.slane %v324_v21, 4  ;;  %v327_v29 = vshll.u32 %v207_v17, 16  ;;  %v333_v30 = vshll.u32 %v2892_v19, 16  ;;  %v2902_v35 = vld [vmem:[%s2878_s7 + $0x4c] sm:$0xf] }
  0x18   : > { %v282_v31 = vor.u32 %v281_v23, %v278_v22  ;;  %v292_v32 = vor.u32 %v291_v25, %v287_v24  ;;  %v337_v33 = vshrl.u32 %v2892_v19, 16  ;;  %v343_v34 = vshll.u32 %v2895_v20, 16  ;;  %v2911_v46 = vld [vmem:[%s2878_s7 + $0x50] sm:$0x1]  ;;  %v199_v54 = vld [vmem:[%s2878_s7] sm:$0xf] }
  0x19   : > { %v329_v37 = vrot.slane %v327_v29, 5  ;;  %v335_v38 = vrot.slane %v333_v30, 5  ;;  %v372_v39 = vshrl.u32 %v211_v26, 16  ;;  %v375_v40 = vshll.u32 %v211_v26, 16  ;;  %v2924_v2 = vld [vmem:[%s2878_s7 + $0x4] sm:$0xf] }
  0x1a   : > { %v283_v41 = vrot.slane %v282_v31, 4  ;;  %v293_v42 = vrot.slane %v292_v32, 4  ;;  %v339_v43 = vrot.slane %v337_v33, 4  ;;  %v345_v44 = vrot.slane %v343_v34, 5  ;;  %v2929_v8 = vld [vmem:[%s2878_s7 + $0x8] sm:$0x1] }
  0x1b   : > { %v330_v45 = vor.u32 %v329_v37, %v326_v28  ;;  %v374_v47 = vrot.slane %v372_v39, 4  ;;  %v377_v48 = vrot.slane %v375_v40, 5  ;;  %v381_v49 = vshll.u32 %v2902_v35, 16  ;;  %v205_v15 = vld [vmem:[%s2878_s7 + $0x24] sm:$0xf]  ;;  %p187_p6 = scmp.lt.s32.totalorder %s2381_s23, 31 }
  0x1c   : > { %v288_v50 = vsel %vm2906_vm4, %v283_v41, %v287_v24  ;;  %v298_v51 = vsel %vm2906_vm4, %v293_v42, %v297_v27  ;;  %v340_v52 = vor.u32 %v339_v43, %v335_v38  ;;  %v385_v53 = vshrl.u32 %v2902_v35, 16  ;;  %v2940_v26 = vld [vmem:[%s2878_s7 + $0x28] sm:$0xf]  ;;  %v2945_v30 = vld [vmem:[%s2878_s7 + $0x2c] sm:$0x1]  ;;  %s2382_s24 = sshll.u32 %s3687_s13, 5 }
  0x1d   : > { %v425_v55 = vunpack.c.l.b16 %v288_v50  ;;  %v426_v56 = vunpack.c.l.b16 %v298_v51  ;;  %v331_v57 = vrot.slane %v330_v45, 4  ;;  %v378_v58 = vor.u32 %v377_v48, %v374_v47  ;;  %v2953_v51 = vld [vmem:[%s2878_s7 + $0x40] sm:$0xf]  ;;  %s3689_s23 = smov (!%p187_p6, %s2381_s23), 31 }
  0x1e   : > { %v341_v59 = vrot.slane %v340_v52, 4  ;;  %v383_v60 = vrot.slane %v381_v49, 5  ;;  %v387_v61 = vrot.slane %v385_v53, 4  ;;  %v391_v62 = vshll.u32 %v2911_v46, 16  ;;  %s190_s25 = sadd.s32 %s2382_s24, %s3689_s23 }
  0x1f   : > { %v439_v63 = vpack.c.b16 %v426_v56, %v425_v55  ;;  %v336_v0 = vsel %vm2906_vm4, %v331_v57, %v335_v38  ;;  %v379_v1 = vrot.slane %v378_v58, 4  ;;  %v228_v3 = vshrl.u32 %v199_v54, 16  ;;  %v209_v38 = vld [vmem:[%s2878_s7 + $0x3c] sm:$0xf]  ;;  %v2959_v56 = vld [vmem:[%s2878_s7 + $0x44] sm:$0x1] }
  0x20   : > { %v346_v4 = vsel %vm2906_vm4, %v341_v59, %v345_v44  ;;  %v429_v5 = vunpack.c.l.b16 %v336_v0  ;;  %v388_v6 = vor.u32 %v387_v61, %v383_v60  ;;  %v393_v7 = vrot.slane %v391_v62, 5  ;;  %v213_v58 = vld [vmem:[%s2878_s7 + $0x54] sm:$0xf]  ;;  %s2383_s27 = sshll.u32 %s190_s25, 2 }
  0x21   : > { %2390 = vmatmul.msk.bf16.vlgmr.msra.gmra.mxu1 %vm445_vm3, %v439_v63  ;;  %v430_v9 = vunpack.c.l.b16 %v346_v4  ;;  %v384_v10 = vsel %vm2906_vm4, %v379_v1, %v383_v60  ;;  %v230_v13 = vrot.slane %v228_v3, 4  ;;  %v231_v14 = vshll.u32 %v199_v54, 16  ;;  %s3590_s29 = scalar_lea.vmem %s3671_s3, %s2383_s27 }
  0x22   : > { %v389_v16 = vrot.slane %v388_v6, 4  ;;  %v433_v17 = vunpack.c.l.b16 %v384_v10  ;;  %v237_v18 = vshll.u32 %v2924_v2, 16  ;;  %v241_v21 = vshrl.u32 %v2924_v2, 16 }
  0x23   : > { %v441_v22 = vpack.c.b16 %v430_v9, %v429_v5  ;;  %v233_v23 = vrot.slane %v231_v14, 5  ;;  %v247_v24 = vshll.u32 %v2929_v8, 16  ;;  %v671_v25 = vrot.slane %v2929_v8, 5 }
  0x24   : > { %v394_v27 = vsel %vm2906_vm4, %v389_v16, %v393_v7  ;;  %v239_v28 = vrot.slane %v237_v18, 5  ;;  %v243_v29 = vrot.slane %v241_v21, 4  ;;  %v300_v31 = vshrl.u32 %v205_v15, 16  ;;  %v2973_v16 = vld [vmem:[%s2878_s7 + $0x5c] sm:$0x1] }
  0x25   : > { %2392 = vmatmul.msk.bf16.vlgmr.msra.gmra.mxu2 %vm445_vm3, %v441_v22  ;;  %v434_v32 = vunpack.c.l.b16 %v394_v27  ;;  %v234_v33 = vor.u32 %v233_v23, %v230_v13  ;;  %v249_v34 = vrot.slane %v247_v24, 5  ;;  %v303_v37 = vshll.u32 %v205_v15, 16  ;;  %v2970_v15 = vld [vmem:[%s2878_s7 + $0x58] sm:$0xf]  ;;  %v201_v23 = vld [vmem:[%s2878_s7 + $0xc] sm:$0xf] }
  0x26   : > { %v244_v39 = vor.u32 %v243_v29, %v239_v28  ;;  %v302_v40 = vrot.slane %v300_v31, 4  ;;  %v309_v41 = vshll.u32 %v2940_v26, 16  ;;  %v313_v42 = vshrl.u32 %v2940_v26, 16 }
  0x27   : > { %v443_v43 = vpack.c.b16 %v434_v32, %v433_v17  ;;  %v235_v44 = vrot.slane %v234_v33, 4  ;;  %v305_v45 = vrot.slane %v303_v37, 5  ;;  %v319_v47 = vshll.u32 %v2945_v30, 16 }
  0x28   : > { %v245_v48 = vrot.slane %v244_v39, 4  ;;  %v311_v49 = vrot.slane %v309_v41, 5  ;;  %v315_v50 = vrot.slane %v313_v42, 4  ;;  %v348_v52 = vshrl.u32 %v209_v38, 16 }
  0x29   : > { %2394 = vmatmul.msk.bf16.vlgmr.msra.gmra.mxu3 %vm445_vm3, %v443_v43  ;;  %v240_v53 = vsel %vm2906_vm4, %v235_v44, %v239_v28  ;;  %v306_v54 = vor.u32 %v305_v45, %v302_v40  ;;  %v321_v55 = vrot.slane %v319_v47, 5  ;;  %v351_v57 = vshll.u32 %v209_v38, 16  ;;  %v2985_v40 = vld [vmem:[%s2878_s7 + $0x10] sm:$0xf]  ;;  %v2988_v47 = vld [vmem:[%s2878_s7 + $0x14] sm:$0x1] }
  0x2a   : > { %v250_v59 = vsel %vm2906_vm4, %v245_v48, %v249_v34  ;;  %v421_v60 = vunpack.c.l.b16 %v240_v53  ;;  %v316_v61 = vor.u32 %v315_v50, %v311_v49  ;;  %v350_v62 = vrot.slane %v348_v52, 4 }
  0x2b   : > { %v422_v63 = vunpack.c.l.b16 %v250_v59  ;;  %v307_v0 = vrot.slane %v306_v54, 4  ;;  %v353_v1 = vrot.slane %v351_v57, 5  ;;  %v357_v3 = vshll.u32 %v2953_v51, 16 }
  0x2c   : > { %v317_v4 = vrot.slane %v316_v61, 4  ;;  %v361_v5 = vshrl.u32 %v2953_v51, 16  ;;  %v367_v6 = vshll.u32 %v2959_v56, 16  ;;  %v396_v7 = vshrl.u32 %v213_v58, 16 }
  0x2d   : > { %v437_v9 = vpack.c.b16 %v422_v63, %v421_v60  ;;  %v312_v10 = vsel %vm2906_vm4, %v307_v0, %v311_v49  ;;  %v354_v13 = vor.u32 %v353_v1, %v350_v62  ;;  %v359_v14 = vrot.slane %v357_v3, 5  ;;  %v639_v1 = vld [vmem:[%s2878_s7] sm:$0xe] }
  0x2e   : > { %v322_v17 = vsel %vm2906_vm4, %v317_v4, %v321_v55  ;;  %v427_v18 = vunpack.c.l.b16 %v312_v10  ;;  %v363_v21 = vrot.slane %v361_v5, 4  ;;  %v369_v22 = vrot.slane %v367_v6, 5 }
  0x2f   : > { %2388 = vmatmul.msk.bf16.vlgmr.msra.gmra.mxu0 %vm445_vm3, %v437_v9  ;;  %v428_v24 = vunpack.c.l.b16 %v322_v17  ;;  %v355_v27 = vrot.slane %v354_v13, 4  ;;  %v398_v28 = vrot.slane %v396_v7, 4  ;;  %v399_v29 = vshll.u32 %v213_v58, 16  ;;  %v2588_v7 = vld [vmem:[%s3669_s1 + $0xc] sm:$0x3] }
  0x30   : > { %v364_v31 = vor.u32 %v363_v21, %v359_v14  ;;  %v405_v32 = vshll.u32 %v2970_v15, 16  ;;  %v409_v33 = vshrl.u32 %v2970_v15, 16  ;;  %v415_v34 = vshll.u32 %v2973_v16, 16  ;;  %v2512_v9 = vld [vmem:[%s2878_s7 + $0xc] sm:$0xf] }
  0x31   : > { %v440_v37 = vpack.c.b16 %v428_v24, %v427_v18  ;;  %v360_v38 = vsel %vm2906_vm4, %v355_v27, %v359_v14  ;;  %v401_v39 = vrot.slane %v399_v29, 5  ;;  %v252_v41 = vshrl.u32 %v201_v23, 16  ;;  %v3009_v27 = vld [vmem:[%s2878_s7 + $0x10] sm:$0xf] }
  0x32   : > { %v365_v42 = vrot.slane %v364_v31, 4  ;;  %v431_v43 = vunpack.c.l.b16 %v360_v38  ;;  %v407_v44 = vrot.slane %v405_v32, 5  ;;  %v411_v45 = vrot.slane %v409_v33, 4 }
  0x33   : > { %2391 = vmatmul.msk.bf16.gmra.mxu1 %vm445_vm3, %v440_v37  ;;  %v402_v48 = vor.u32 %v401_v39, %v398_v28  ;;  %v417_v49 = vrot.slane %v415_v34, 5  ;;  %v254_v50 = vrot.slane %v252_v41, 4  ;;  %v255_v52 = vshll.u32 %v201_v23, 16  ;;  %v3019_v37 = vld [vmem:[%s2878_s7 + $0x14] sm:$0x1] }
  0x34   : > { %v370_v53 = vsel %vm2906_vm4, %v365_v42, %v369_v22  ;;  %v412_v54 = vor.u32 %v411_v45, %v407_v44  ;;  %v261_v55 = vshll.u32 %v2985_v40, 16  ;;  %v265_v57 = vshrl.u32 %v2985_v40, 16  ;;  %v2653_v41 = vld [vmem:[%s3669_s1 + $0xe] sm:$0x3]  ;;  %v2561_v45 = vld [vmem:[%s3669_s1 + $0xa] sm:$0x3] }
  0x35   : > { %v432_v58 = vunpack.c.l.b16 %v370_v53  ;;  %v403_v59 = vrot.slane %v402_v48, 4  ;;  %v257_v60 = vrot.slane %v255_v52, 5  ;;  %v271_v61 = vshll.u32 %v2988_v47, 16  ;;  %v2678_v53 = vld [vmem:[%s3669_s1 + $0x10] sm:$0x3] }
  0x36   : > { %v413_v62 = vrot.slane %v412_v54, 4  ;;  %v263_v63 = vrot.slane %v261_v55, 5  ;;  %v267_v0 = vrot.slane %v265_v57, 4  ;;  %v2436_v21 = vrot.slane %v639_v1, 9  ;;  %v2690_v55 = vld [vmem:[%s2878_s7] sm:$0xff] }
  0x37   : > { %v442_v3 = vpack.c.b16 %v432_v58, %v431_v43  ;;  %v408_v4 = vsel %vm2906_vm4, %v403_v59, %v407_v44  ;;  %v258_v5 = vor.u32 %v257_v60, %v254_v50  ;;  %v273_v6 = vrot.slane %v271_v61, 5 }
  0x38   : > { %v418_v10 = vsel %vm2906_vm4, %v413_v62, %v417_v49  ;;  %v435_v13 = vunpack.c.l.b16 %v408_v4  ;;  %v268_v14 = vor.u32 %v267_v0, %v263_v63  ;;  %v668_v22 = vrot.slane %v2924_v2, 5  ;;  %v3050_v4 = vld [vmem:[%s2878_s7 + $0x1c] sm:$0xf] }
  0x39   : > { %2393 = vmatmul.msk.bf16.gmra.mxu2 %vm445_vm3, %v442_v3  ;;  %v436_v17 = vunpack.c.l.b16 %v418_v10  ;;  %v259_v18 = vrot.slane %v258_v5, 4  ;;  %v1621_v24 = vsel %vm470_vm0, %v2588_v7, 0  ;;  %v1019_v28 = vshrl.u32 %v2512_v9, 16  ;;  %v2515_v3 = vld [vmem:[%s2878_s7 + $0x18] sm:$0xf] }
  0x3a   : > { %v269_v23 = vrot.slane %v268_v14, 4  ;;  %v1022_v29 = vshll.u32 %v2512_v9, 16  ;;  %v670_v34 = vrot.slane %v668_v22, 4  ;;  %1630 = vmatpush.bf16.msra.mxu2 %v1621_v24  ;;  %v1028_v44 = vshll.u32 %v3009_v27, 16  ;;  %v641_v5 = vld [vmem:[%s2878_s7 + $0x18] sm:$0xe] }
  0x3b   : > { %v444_v31 = vpack.c.b16 %v436_v17, %v435_v13  ;;  %v264_v32 = vsel %vm2906_vm4, %v259_v18, %v263_v63  ;;  %v1021_v39 = vrot.slane %v1019_v28, 4  ;;  %v669_v48 = vsel %vm3014_vm7, %v2436_v21, %v668_v22  ;;  %v640_v7 = vld [vmem:[%s2878_s7 + $0xc] sm:$0xe] }
  0x3c   : > { %v274_v2 = vsel %vm2906_vm4, %v269_v23, %v273_v6  ;;  %v423_v38 = vunpack.c.l.b16 %v264_v32  ;;  %v1024_v43 = vrot.slane %v1022_v29, 5  ;;  %v672_v49 = vsel %vm3014_vm7, %v670_v34, %v671_v25  ;;  %v2698_v34 = vld [vmem:[%s2878_s7 + $0xc] sm:$0xff] }
  0x3d   : > { %2395 = vmatmul.msk.bf16.gmra.mxu3 %vm445_vm3, %v444_v31  ;;  %v424_v42 = vunpack.c.l.b16 %v274_v2  ;;  %v1032_v50 = vshrl.u32 %v3009_v27, 16  ;;  %v1038_v52 = vshll.u32 %v3019_v37, 16  ;;  %v1030_v58 = vrot.slane %v1028_v44, 5 }
  0x3e   : > { %v1025_v57 = vor.u32 %v1024_v43, %v1021_v39  ;;  %v1955_v59 = vsel %vm470_vm0, %v2653_v41, 0  ;;  %v1467_v25 = vsel %vm470_vm0, %v2561_v45, 0  ;;  %v724_v60 = vunpack.c.l.b16 %v669_v48 }
  0x3f   : > { %v438_v54 = vpack.c.b16 %v424_v42, %v423_v38  ;;  %v1034_v8 = vrot.slane %v1032_v50, 4  ;;  %1964 = vmatpush.bf16.msra.mxu3 %v1955_v59  ;;  %v725_v61 = vunpack.c.l.b16 %v672_v49  ;;  %1476 = vmatpush.bf16.msra.mxu1 %v1467_v25  ;;  %v2161_v63 = vsel %vm470_vm0, %v2678_v53, 0 }
  0x40   : > { %v1026_v62 = vrot.slane %v1025_v57, 4  ;;  %v1040_v1 = vrot.slane %v1038_v52, 5  ;;  %2170 = vmatpush.bf16.msra.mxu0 %v2161_v63  ;;  %v675_v9 = vrot.slane %v2985_v40, 5  ;;  %v1043_v14 = vshrl.u32 %v2515_v3, 16  ;;  %v642_v63 = vld [vmem:[%s2878_s7 + $0x24] sm:$0xe] }
  0x41   : > { %2389 = vmatmul.msk.bf16.gmra.mxu0 %vm445_vm3, %v438_v54  ;;  %v1035_v0 = vor.u32 %v1034_v8, %v1030_v58  ;;  %v740_v10 = vpack.c.b16 %v725_v61, %v724_v60  ;;  %v1046_v17 = vshll.u32 %v2515_v3, 16  ;;  %v1052_v21 = vshll.u32 %v3050_v4, 16  ;;  %v2518_v61 = vld [vmem:[%s2878_s7 + $0x24] sm:$0xf] }
  0x42   : > { %v1031_v13 = vsel %vm2906_vm4, %v1026_v62, %v1030_v58  ;;  %v1056_v22 = vshrl.u32 %v3050_v4, 16  ;;  %v2438_v23 = vrot.slane %v641_v5, 9  ;;  %v2437_v24 = vrot.slane %v640_v7, 9  ;;  %v3084_v62 = vld [vmem:[%s2878_s7 + $0x28] sm:$0xf] }
  0x43   : > { %2428 = vmatmul.msk.bf16.vlgmr.msrb.gmra.mxu1 %vm445_vm3, %v2690_v55  ;;  %v1036_v6 = vrot.slane %v1035_v0, 4  ;;  %v682_v28 = vrot.slane %v2882_v11, 5  ;;  %v1212_v40 = vunpack.c.l.b16 %v1031_v13  ;;  %v677_v29 = vrot.slane %v675_v9, 4  ;;  %v3069_v11 = vld [vmem:[%s2878_s7 + $0x20] sm:$0x1]  ;;  %v2691_v55 = vld [vmem:[%s2878_s7 + $0xc] sm:$0xff] }
  0x44   : > { %v678_v31 = vrot.slane %v2988_v47, 5  ;;  %v685_v32 = vrot.slane %v2885_v12, 5  ;;  %v1045_v38 = vrot.slane %v1043_v14, 4  ;;  %v1048_v39 = vrot.slane %v1046_v17, 5 }
  0x45   : > { %v1041_v18 = vsel %vm2906_vm4, %v1036_v6, %v1040_v1  ;;  %v683_v41 = vsel %vm3014_vm7, %v2438_v23, %v682_v28  ;;  %v1054_v42 = vrot.slane %v1052_v21, 5  ;;  %v1058_v43 = vrot.slane %v1056_v22, 4  ;;  %v2699_v22 = vld [vmem:[%s2878_s7 + $0x18] sm:$0xff] }
  0x46   : > { %v1213_v2 = vunpack.c.l.b16 %v1041_v18  ;;  %v684_v44 = vrot.slane %v682_v28, 4  ;;  %v728_v45 = vunpack.c.l.b16 %v683_v41  ;;  %v676_v47 = vsel %vm3014_vm7, %v2437_v24, %v675_v9 }
  0x47   : > { %v679_v49 = vsel %vm3014_vm7, %v677_v29, %v678_v31  ;;  %v1049_v50 = vor.u32 %v1048_v39, %v1045_v38  ;;  %v1059_v53 = vor.u32 %v1058_v43, %v1054_v42  ;;  %v1062_v54 = vshll.u32 %v3069_v11, 16  ;;  %v2521_v43 = vld [vmem:[%s2878_s7 + $0x30] sm:$0xf] }
  0x48   : > { %v686_v12 = vsel %vm3014_vm7, %v684_v44, %v685_v32  ;;  %v1228_v48 = vpack.c.b16 %v1213_v2, %v1212_v40  ;;  %v726_v58 = vunpack.c.l.b16 %v676_v47  ;;  %v727_v59 = vunpack.c.l.b16 %v679_v49  ;;  %v3110_v44 = vld [vmem:[%s2878_s7 + $0x34] sm:$0xf] }
  0x49   : > { %2445 = vmatmul.msk.bf16.vlgmr.msrb.gmra.mxu2 %vm445_vm3, %v740_v10  ;;  %v729_v52 = vunpack.c.l.b16 %v686_v12  ;;  %v1050_v8 = vrot.slane %v1049_v50, 4  ;;  %v1060_v25 = vrot.slane %v1059_v53, 4  ;;  %v1064_v60 = vrot.slane %v1062_v54, 5 }
  0x4a   : > { %v689_v0 = vrot.slane %v2940_v26, 5  ;;  %v692_v1 = vrot.slane %v2945_v30, 5  ;;  %v741_v3 = vpack.c.b16 %v727_v59, %v726_v58  ;;  %v2439_v5 = vrot.slane %v642_v63, 9  ;;  %v3122_v63 = vld [vmem:[%s2878_s7 + $0x38] sm:$0x1] }
  0x4b   : > { %v742_v57 = vpack.c.b16 %v729_v52, %v728_v45  ;;  %v1055_v6 = vsel %vm2906_vm4, %v1050_v8, %v1054_v42  ;;  %v1067_v7 = vshrl.u32 %v2518_v61, 16  ;;  %v1070_v9 = vshll.u32 %v2518_v61, 16  ;;  %v2692_v42 = vld [vmem:[%s2878_s7 + $0x18] sm:$0xff] }
  0x4c   : > { %v691_v10 = vrot.slane %v689_v0, 4  ;;  %v1065_v13 = vsel %vm2906_vm4, %v1060_v25, %v1064_v60  ;;  %v1076_v14 = vshll.u32 %v3084_v62, 16  ;;  %v1080_v17 = vshrl.u32 %v3084_v62, 16  ;;  %v2700_v25 = vld [vmem:[%s2878_s7 + $0x24] sm:$0xff] }
  0x4d   : > { %2504 = vmatmul.msk.bf16.vlgmr.msrb.gmra.mxu3 %vm445_vm3, %v2698_v34  ;;  %v690_v26 = vsel %vm3014_vm7, %v2439_v5, %v689_v0  ;;  %v1214_v23 = vunpack.c.l.b16 %v1055_v6  ;;  %v1215_v24 = vunpack.c.l.b16 %v1065_v13  ;;  %v1069_v28 = vrot.slane %v1067_v7, 4  ;;  %v3102_v34 = vld [vmem:[%s2878_s7 + $0x2c] sm:$0x1]  ;;  %v2693_v6 = vld [vmem:[%s2878_s7 + $0x24] sm:$0xff]  ;;  %v3130_v13 = vld [vmem:[%s2878_s7 + $0x40] sm:$0xf] }
  0x4e   : > { %v693_v30 = vsel %vm3014_vm7, %v691_v10, %v692_v1  ;;  %v730_v18 = vunpack.c.l.b16 %v690_v26  ;;  %v1072_v40 = vrot.slane %v1070_v9, 5  ;;  %v1078_v29 = vrot.slane %v1076_v14, 5  ;;  %v643_v26 = vld [vmem:[%s2878_s7 + $0x30] sm:$0xe] }
  0x4f   : > { %v731_v21 = vunpack.c.l.b16 %v693_v30  ;;  %v1082_v31 = vrot.slane %v1080_v17, 4  ;;  %v1229_v2 = vpack.c.b16 %v1215_v24, %v1214_v23  ;;  %v1086_v41 = vshll.u32 %v3102_v34, 16 }
  0x50   : > { %v1073_v38 = vor.u32 %v1072_v40, %v1069_v28  ;;  %v1094_v49 = vshll.u32 %v2521_v43, 16  ;;  %v1100_v50 = vshll.u32 %v3110_v44, 16  ;;  %v1104_v52 = vshrl.u32 %v3110_v44, 16 }
  0x51   : > { %2537 = vmatmul.msk.bf16.vlgmr.msrb.gmra.mxu0 %vm445_vm3, %v1228_v48  ;;  %v743_v32 = vpack.c.b16 %v731_v21, %v730_v18  ;;  %v1083_v39 = vor.u32 %v1082_v31, %v1078_v29  ;;  %v1088_v12 = vrot.slane %v1086_v41, 5  ;;  %v1091_v48 = vshrl.u32 %v2521_v43, 16  ;;  %v3145_v43 = vld [vmem:[%s2878_s7 + $0x44] sm:$0x1] }
  0x52   : > { %v1074_v45 = vrot.slane %v1073_v38, 4  ;;  %v1096_v58 = vrot.slane %v1094_v49, 5  ;;  %v1102_v59 = vrot.slane %v1100_v50, 5  ;;  %v1106_v8 = vrot.slane %v1104_v52, 4  ;;  %v2694_v49 = vld [vmem:[%s2878_s7 + $0x30] sm:$0xff] }
  0x53   : > { %2429 = vmatmul.msk.bf16.gmra.mxu1 %vm445_vm3, %v2691_v55  ;;  %v1084_v47 = vrot.slane %v1083_v39, 4  ;;  %v1093_v55 = vrot.slane %v1091_v48, 4  ;;  %v1124_v21 = vshll.u32 %v3130_v13, 16  ;;  %v696_v23 = vrot.slane %v2892_v19, 5 }
  0x54   : > { %v1079_v53 = vsel %vm2906_vm4, %v1074_v45, %v1078_v29  ;;  %v1107_v1 = vor.u32 %v1106_v8, %v1102_v59  ;;  %v2440_v40 = vrot.slane %v643_v26, 9  ;;  %v2701_v29 = vld [vmem:[%s2878_s7 + $0x30] sm:$0xff] }
  0x55   : > { %v1089_v54 = vsel %vm2906_vm4, %v1084_v47, %v1088_v12  ;;  %v1216_v60 = vunpack.c.l.b16 %v1079_v53  ;;  %v1097_v0 = vor.u32 %v1096_v58, %v1093_v55  ;;  %v1126_v38 = vrot.slane %v1124_v21, 5  ;;  %v2527_v55 = vld [vmem:[%s2878_s7 + $0x48] sm:$0xf]  ;;  %v3158_v58 = vld [vmem:[%s2878_s7 + $0x4c] sm:$0xf] }
  0x56   : > { %v1217_v61 = vunpack.c.l.b16 %v1089_v54  ;;  %v1108_v9 = vrot.slane %v1107_v1, 4  ;;  %v698_v41 = vrot.slane %v696_v23, 4  ;;  %v697_v19 = vsel %vm3014_vm7, %v2440_v40, %v696_v23  ;;  %v2695_v40 = vld [vmem:[%s2878_s7 + $0x3c] sm:$0xff] }
  0x57   : > { %v1098_v7 = vrot.slane %v1097_v0, 4  ;;  %v1134_v12 = vshll.u32 %v3145_v43, 16  ;;  %v1139_v0 = vshrl.u32 %v2527_v55, 16  ;;  %v1142_v1 = vshll.u32 %v2527_v55, 16 }
  0x58   : > { %v1230_v5 = vpack.c.b16 %v1217_v61, %v1216_v60  ;;  %v703_v60 = vrot.slane %v2953_v51, 5  ;;  %v644_v61 = vld [vmem:[%s2878_s7 + $0x3c] sm:$0xe] }
  0x59   : > { %2446 = vmatmul.msk.bf16.gmra.mxu2 %vm445_vm3, %v741_v3  ;;  %v1110_v3 = vshll.u32 %v3122_v63, 16  ;;  %v1103_v14 = vsel %vm2906_vm4, %v1098_v7, %v1102_v59  ;;  %v1136_v54 = vrot.slane %v1134_v12, 5  ;;  %v2702_v7 = vld [vmem:[%s2878_s7 + $0x3c] sm:$0xff]  ;;  %v1144_v51 = vrot.slane %v1142_v1, 5 }
  0x5a   : > { %v1218_v24 = vunpack.c.l.b16 %v1103_v14  ;;  %v706_v14 = vrot.slane %v2959_v56, 5  ;;  %v3199_v1 = vld [vmem:[%s2878_s7 + $0x5c] sm:$0x1] }
  0x5b   : > { %v1112_v10 = vrot.slane %v1110_v3, 5  ;;  %v1148_v3 = vshll.u32 %v3158_v58, 16 }
  0x5d   : > { %2505 = vmatmul.msk.bf16.gmra.mxu3 %vm445_vm3, %v2699_v22  ;;  %v1113_v17 = vsel %vm2906_vm4, %v1108_v9, %v1112_v10  ;;  %v1128_v22 = vshrl.u32 %v3130_v13, 16  ;;  %v2441_v10 = vrot.slane %v644_v61, 9  ;;  %v1150_v26 = vrot.slane %v1148_v3, 5 }
  0x5e   : > { %v1219_v28 = vunpack.c.l.b16 %v1113_v17  ;;  %v1141_v17 = vrot.slane %v1139_v0, 4  ;;  %v713_v61 = vrot.slane %v2911_v46, 5  ;;  %v1182_v46 = vshll.u32 %v3199_v1, 16 }
  0x5f   : > { %v1130_v39 = vrot.slane %v1128_v22, 4  ;;  %v704_v22 = vsel %vm3014_vm7, %v2441_v10, %v703_v60  ;;  %v2696_v10 = vld [vmem:[%s2878_s7 + $0x48] sm:$0xff] }
  0x60   : > { %v1231_v45 = vpack.c.b16 %v1219_v28, %v1218_v24  ;;  %v1145_v24 = vor.u32 %v1144_v51, %v1141_v17 }
  0x61   : > { %2538 = vmatmul.msk.bf16.gmra.mxu0 %vm445_vm3, %v1229_v2  ;;  %v1131_v47 = vor.u32 %v1130_v39, %v1126_v38 }
  0x63   : > { %2430 = vmatmul.msk.bf16.gmra.mxu1 %vm445_vm3, %v2692_v42  ;;  %v699_v42 = vrot.slane %v2895_v20, 5  ;;  %v732_v20 = vunpack.c.l.b16 %v697_v19  ;;  %v1132_v53 = vrot.slane %v1131_v47, 4 }
  0x65   : > { %v700_v48 = vsel %vm3014_vm7, %v698_v41, %v699_v42  ;;  %v3184_v42 = vld [vmem:[%s2878_s7 + $0x58] sm:$0xf] }
  0x66   : > { %v733_v50 = vunpack.c.l.b16 %v700_v48  ;;  %v1172_v47 = vshll.u32 %v3184_v42, 16 }
  0x68   : > { %v744_v59 = vpack.c.b16 %v733_v50, %v732_v20  ;;  %v1176_v20 = vshrl.u32 %v3184_v42, 16  ;;  %v645_v50 = vld [vmem:[%s2878_s7 + $0x48] sm:$0xe] }
  0x69   : > { %2447 = vmatmul.msk.bf16.gmra.mxu2 %vm445_vm3, %v742_v57  ;;  %v2524_v57 = vld [vmem:[%s2878_s7 + $0x3c] sm:$0xf] }
  0x6a   : > { %v1115_v30 = vshrl.u32 %v2524_v57, 16  ;;  %v1118_v18 = vshll.u32 %v2524_v57, 16  ;;  %v705_v57 = vrot.slane %v703_v60, 4  ;;  %v1178_v0 = vrot.slane %v1176_v20, 4 }
  0x6c   : > { %v1117_v31 = vrot.slane %v1115_v30, 4  ;;  %v1120_v2 = vrot.slane %v1118_v18, 5  ;;  %v3172_v18 = vld [vmem:[%s2878_s7 + $0x50] sm:$0x1]  ;;  %v707_v23 = vsel %vm3014_vm7, %v705_v57, %v706_v14 }
  0x6d   : > { %2506 = vmatmul.msk.bf16.gmra.mxu3 %vm445_vm3, %v2700_v25  ;;  %v1137_v25 = vsel %vm2906_vm4, %v1132_v53, %v1136_v54  ;;  %v1158_v56 = vshll.u32 %v3172_v18, 16  ;;  %v2703_v54 = vld [vmem:[%s2878_s7 + $0x48] sm:$0xff] }
  0x6e   : > { %v1221_v9 = vunpack.c.l.b16 %v1137_v25  ;;  %v2442_v25 = vrot.slane %v645_v50, 9  ;;  %v3232_v50 = vld [vmem:[%s2878_s7 + $0x68] sm:$0x1] }
  0x6f   : > { %v1160_v41 = vrot.slane %v1158_v56, 5 }
  0x71   : > { %2539 = vmatmul.msk.bf16.gmra.mxu0 %vm445_vm3, %v1230_v5  ;;  %v1152_v5 = vshrl.u32 %v3158_v58, 16 }
  0x73   : > { %2431 = vmatmul.msk.bf16.gmra.mxu1 %vm445_vm3, %v2693_v6  ;;  %v1154_v30 = vrot.slane %v1152_v5, 4 }
  0x75   : > { %v1155_v28 = vor.u32 %v1154_v30, %v1150_v26  ;;  %v2533_v30 = vld [vmem:[%s2878_s7 + $0x60] sm:$0xf] }
  0x77   : > { %v1156_v39 = vrot.slane %v1155_v28, 4  ;;  %v1190_v28 = vshll.u32 %v2533_v30, 16 }
  0x79   : > { %2448 = vmatmul.msk.bf16.gmra.mxu2 %vm445_vm3, %v743_v32  ;;  %v1121_v32 = vor.u32 %v1120_v2, %v1117_v31  ;;  %v735_v31 = vunpack.c.l.b16 %v707_v23  ;;  %v2530_v2 = vld [vmem:[%s2878_s7 + $0x54] sm:$0xf]  ;;  %v1161_v48 = vsel %vm2906_vm4, %v1156_v39, %v1160_v41 }
  0x7a   : > { %v1166_v19 = vshll.u32 %v2530_v2, 16 }
  0x7b   : > { %v1122_v52 = vrot.slane %v1121_v32, 4 }
  0x7c   : > { %v1168_v53 = vrot.slane %v1166_v19, 5 }
  0x7d   : > { %2507 = vmatmul.msk.bf16.gmra.mxu3 %vm445_vm3, %v2701_v29  ;;  %v1127_v8 = vsel %vm2906_vm4, %v1122_v52, %v1126_v38  ;;  %v734_v29 = vunpack.c.l.b16 %v704_v22  ;;  %v1146_v38 = vrot.slane %v1145_v24, 4  ;;  %v1187_v24 = vshrl.u32 %v2533_v30, 16 }
  0x7e   : > { %v1220_v6 = vunpack.c.l.b16 %v1127_v8  ;;  %v1174_v8 = vrot.slane %v1172_v47, 5  ;;  %v1192_v47 = vrot.slane %v1190_v28, 5 }
  0x7f   : > { %v745_v32 = vpack.c.b16 %v735_v31, %v734_v29  ;;  %v1151_v12 = vsel %vm2906_vm4, %v1146_v38, %v1150_v26  ;;  %v1184_v26 = vrot.slane %v1182_v46, 5  ;;  %v717_v31 = vrot.slane %v2970_v15, 5  ;;  %v646_v38 = vld [vmem:[%s2878_s7 + $0x54] sm:$0xe] }
  0x80   : > { %v1232_v21 = vpack.c.b16 %v1221_v9, %v1220_v6  ;;  %v1222_v55 = vunpack.c.l.b16 %v1151_v12  ;;  %v1179_v9 = vor.u32 %v1178_v0, %v1174_v8  ;;  %v720_v15 = vrot.slane %v2973_v16, 5  ;;  %v2697_v0 = vld [vmem:[%s2878_s7 + $0x54] sm:$0xff] }
  0x81   : > { %2540 = vmatmul.msk.bf16.gmra.mxu0 %vm445_vm3, %v1231_v45  ;;  %v1163_v45 = vshrl.u32 %v2530_v2, 16 }
  0x82   : > { %v1180_v51 = vrot.slane %v1179_v9, 4 }
  0x83   : > { %2432 = vmatmul.msk.bf16.gmra.mxu1 %vm445_vm3, %v2694_v49  ;;  %v710_v49 = vrot.slane %v2902_v35, 5  ;;  %v1165_v52 = vrot.slane %v1163_v45, 4  ;;  %v2704_v45 = vld [vmem:[%s2878_s7 + $0x54] sm:$0xff] }
  0x85   : > { %v712_v60 = vrot.slane %v710_v49, 4  ;;  %v1169_v35 = vor.u32 %v1168_v53, %v1165_v52  ;;  %v711_v6 = vsel %vm3014_vm7, %v2442_v25, %v710_v49  ;;  %v719_v49 = vrot.slane %v717_v31, 4 }
  0x86   : > { %v736_v14 = vunpack.c.l.b16 %v711_v6 }
  0x87   : > { %v1170_v57 = vrot.slane %v1169_v35, 4  ;;  %v721_v25 = vsel %vm3014_vm7, %v719_v49, %v720_v15  ;;  %v2705_v49 = vld [vmem:[%s2878_s7 + $0x60] sm:$0xff] }
  0x88   : > { %v739_v46 = vunpack.c.l.b16 %v721_v25 }
  0x89   : > { %2449 = vmatmul.msk.bf16.gmra.mxu2 %vm445_vm3, %v744_v59  ;;  %v1223_v59 = vunpack.c.l.b16 %v1161_v48  ;;  %v1175_v22 = vsel %vm2906_vm4, %v1170_v57, %v1174_v8  ;;  %v2443_v48 = vrot.slane %v646_v38, 9 }
  0x8a   : > { %v1224_v39 = vunpack.c.l.b16 %v1175_v22  ;;  %v1365_v22 = vrot.slane %v3019_v37, 5 }
  0x8b   : > { %v1233_v3 = vpack.c.b16 %v1223_v59, %v1222_v55  ;;  %v2629_v59 = vld [vmem:[%s2878_s7 + $0x18] sm:$0xf]  ;;  %v718_v8 = vsel %vm3014_vm7, %v2443_v48, %v717_v31 }
  0x8c   : > { %v1713_v6 = vshrl.u32 %v2629_v59, 16  ;;  %v738_v9 = vunpack.c.l.b16 %v718_v8 }
  0x8d   : > { %2508 = vmatmul.msk.bf16.gmra.mxu3 %vm445_vm3, %v2702_v7  ;;  %v714_v7 = vsel %vm3014_vm7, %v712_v60, %v713_v61  ;;  %v1206_v60 = vshll.u32 %v3232_v50, 16  ;;  %v3246_v61 = vld [vmem:[%s2878_s7 + $0x1c] sm:$0xf] }
  0x8e   : > { %v737_v17 = vunpack.c.l.b16 %v714_v7  ;;  %v1716_v7 = vshll.u32 %v2629_v59, 16  ;;  %v1722_v57 = vshll.u32 %v3246_v61, 16  ;;  %v1715_v28 = vrot.slane %v1713_v6, 4 }
  0x8f   : > { %v1208_v30 = vrot.slane %v1206_v60, 5  ;;  %v2056_v6 = vrot.slane %v3246_v61, 5 }
  0x90   : > { %v746_v23 = vpack.c.b16 %v737_v17, %v736_v14  ;;  %v1726_v14 = vshrl.u32 %v3246_v61, 16  ;;  %v1724_v31 = vrot.slane %v1722_v57, 5 }
  0x91   : > { %2541 = vmatmul.msk.bf16.gmra.mxu0 %vm445_vm3, %v1232_v21  ;;  %v3213_v21 = vld [vmem:[%s2878_s7 + $0x64] sm:$0xf] }
  0x92   : > { %v1196_v56 = vshll.u32 %v3213_v21, 16  ;;  %v1200_v2 = vshrl.u32 %v3213_v21, 16 }
  0x93   : > { %2433 = vmatmul.msk.bf16.gmra.mxu1 %vm445_vm3, %v2695_v40  ;;  %v1185_v40 = vsel %vm2906_vm4, %v1180_v51, %v1184_v26 }
  0x94   : > { %v1225_v19 = vunpack.c.l.b16 %v1185_v40  ;;  %v1198_v12 = vrot.slane %v1196_v56, 5  ;;  %v1202_v20 = vrot.slane %v1200_v2, 4  ;;  %v1718_v56 = vrot.slane %v1716_v7, 5 }
  0x95   : > { %v747_v40 = vpack.c.b16 %v739_v46, %v738_v9  ;;  %v1728_v2 = vrot.slane %v1726_v14, 4  ;;  %v2632_v46 = vld [vmem:[%s2878_s7 + $0x24] sm:$0xf] }
  0x96   : > { %v1203_v16 = vor.u32 %v1202_v20, %v1198_v12  ;;  %v1719_v48 = vor.u32 %v1718_v56, %v1715_v28  ;;  %v2546_v28 = vld [vmem:[%s2878_s7 + $0x18] sm:$0xe]  ;;  %v1737_v56 = vshrl.u32 %v2632_v46, 16 }
  0x97   : > { %v1729_v20 = vor.u32 %v1728_v2, %v1724_v31 }
  0x98   : > { %v1204_v26 = vrot.slane %v1203_v16, 4  ;;  %v1720_v25 = vrot.slane %v1719_v48, 4 }
  0x99   : > { %2450 = vmatmul.msk.bf16.gmra.mxu2 %vm445_vm3, %v745_v32  ;;  %v1189_v32 = vrot.slane %v1187_v24, 4  ;;  %v1730_v60 = vrot.slane %v1729_v20, 4 }
  0x9a   : > { %v1209_v37 = vsel %vm2906_vm4, %v1204_v26, %v1208_v30  ;;  %v1369_v30 = vrot.slane %v3050_v4, 5 }
  0x9b   : > { %v1193_v55 = vor.u32 %v1192_v47, %v1189_v32 }
  0x9d   : > { %2509 = vmatmul.msk.bf16.gmra.mxu3 %vm445_vm3, %v2703_v54  ;;  %v1234_v54 = vpack.c.b16 %v1225_v19, %v1224_v39  ;;  %v1194_v51 = vrot.slane %v1193_v55, 4 }
  0x9e   : > { %v3202_v5 = vpop.f32.mrf.mxu1 }
  0x9f   : > { %v1199_v39 = vsel %vm2906_vm4, %v1194_v51, %v1198_v12  ;;  %v1227_v12 = vunpack.c.l.b16 %v1209_v37  ;;  %v1725_v51 = vsel %vm2906_vm4, %v1720_v25, %v1724_v31  ;;  %v1371_v37 = vrot.slane %v1369_v30, 4 }
  0xa0   : > { %v1226_v15 = vunpack.c.l.b16 %v1199_v39  ;;  %v2554_v39 = vrot.slane %v2546_v28, 9 }
  0xa1   : > { %2542 = vmatmul.msk.bf16.gmra.mxu0 %vm445_vm3, %v1233_v3  ;;  %v1362_v3 = vrot.slane %v3009_v27, 5 }
  0xa2   : > { %v1235_v16 = vpack.c.b16 %v1227_v12, %v1226_v15  ;;  %v1739_v12 = vrot.slane %v1737_v56, 4 }
  0xa3   : > { %2434 = vmatmul.msk.bf16.gmra.mxu1 %vm445_vm3, %v2696_v10  ;;  %v2545_v10 = vld [vmem:[%s2878_s7 + $0xc] sm:$0xe]  ;;  %v1364_v24 = vrot.slane %v1362_v3, 4 }
  0xa5   : > { %v1366_v47 = vsel %vm3014_vm7, %v1364_v24, %v1365_v22 }
  0xa6   : > { %v3221_v29 = vpop.f32.mrf.mxu1  ;;  %v1419_v59 = vunpack.c.l.b16 %v1366_v47  ;;  %v1906_v47 = vunpack.c.l.b16 %v1725_v51 }
  0xa8   : > { %v3226_v41 = vpop.f32.mrf.mxu2 }
  0xa9   : > { %2451 = vmatmul.msk.bf16.gmra.mxu2 %vm445_vm3, %v746_v23  ;;  %v2553_v23 = vrot.slane %v2545_v10, 9  ;;  %v3286_v10 = vld [vmem:[%s2878_s7 + $0x28] sm:$0xf] }
  0xaa   : > { %v1746_v2 = vshll.u32 %v3286_v10, 16  ;;  %v1750_v31 = vshrl.u32 %v3286_v10, 16 }
  0xab   : > { %v1363_v32 = vsel %vm3014_vm7, %v2553_v23, %v1362_v3  ;;  %v2662_v3 = vld [vmem:[%s2878_s7 + $0x18] sm:$0xe]  ;;  %v2058_v23 = vrot.slane %v2056_v6, 4 }
  0xac   : > { %v3234_v52 = vpop.f32.mrf.mxu0  ;;  %v3236_v53 = vpop.f32.mrf.mxu3  ;;  %v1418_v55 = vunpack.c.l.b16 %v1363_v32  ;;  %v2670_v26 = vrot.slane %v2662_v3, 9  ;;  %v2706_v32 = vld [vmem:[%s2878_s7 + $0x18] sm:$0xff] }
  0xad   : > { %2510 = vmatmul.msk.bf16.gmra.mxu3 %vm445_vm3, %v2704_v45  ;;  %v2631_v45 = vld [vmem:[%s2878_s7 + $0x20] sm:$0x1] }
  0xae   : > { %v1434_v9 = vpack.c.b16 %v1419_v59, %v1418_v55  ;;  %v2059_v24 = vrot.slane %v2631_v45, 5  ;;  %v1752_v55 = vrot.slane %v1750_v31, 4  ;;  %v3312_v59 = vld [vmem:[%s2878_s7 + $0x2c] sm:$0x1] }
  0xaf   : > { %v1756_v51 = vshll.u32 %v3312_v59, 16 }
  0xb0   : > { %v3249_v35 = vpop.f32.mrf.mxu1  ;;  %v3256_v17 = vpop.f32.mrf.mxu2 }
  0xb1   : > { %2543 = vmatmul.msk.bf16.gmra.mxu0 %vm445_vm3, %v1234_v54  ;;  %v1732_v54 = vshll.u32 %v2631_v45, 16  ;;  %v2057_v45 = vsel %vm3014_vm7, %v2670_v26, %v2056_v6 }
  0xb2   : > { %v2112_v3 = vunpack.c.l.b16 %v2057_v45 }
  0xb3   : > { %2435 = vmatmul.msk.bf16.gmra.mxu1 %vm445_vm3, %v2697_v0  ;;  %v1734_v0 = vrot.slane %v1732_v54, 5  ;;  %v1748_v54 = vrot.slane %v1746_v2, 5 }
  0xb4   : > { %v3260_v27 = vpop.f32.mrf.mxu0  ;;  %v3262_v38 = vpop.f32.mrf.mxu3 }
  0xb5   : > { %v1735_v22 = vsel %vm2906_vm4, %v1730_v60, %v1734_v0 }
  0xb6   : > { %v1907_v48 = vunpack.c.l.b16 %v1735_v22 }
  0xb8   : > { %v3269_v19 = vpop.f32.mrf.mxu1  ;;  %v1922_v0 = vpack.c.b16 %v1907_v48, %v1906_v47 }
  0xb9   : > { %2452 = vmatmul.msk.bf16.gmra.mxu2 %vm445_vm3, %v747_v40  ;;  %v1740_v40 = vshll.u32 %v2632_v46, 16 }
  0xbb   : > { %v1742_v20 = vrot.slane %v1740_v40, 5  ;;  %v3327_v40 = vld [vmem:[%s2878_s7 + $0x34] sm:$0xf] }
  0xbc   : > { %v3277_v8 = vpop.f32.mrf.mxu2 }
  0xbd   : > { %2511 = vmatmul.msk.bf16.gmra.mxu3 %vm445_vm3, %v2705_v49  ;;  %v2060_v49 = vsel %vm3014_vm7, %v2058_v23, %v2059_v24  ;;  %v1743_v46 = vor.u32 %v1742_v20, %v1739_v12  ;;  %v2663_v24 = vld [vmem:[%s2878_s7 + $0x24] sm:$0xe]  ;;  %v1376_v12 = vrot.slane %v3084_v62, 5  ;;  %v1770_v20 = vshll.u32 %v3327_v40, 16 }
  0xbe   : > { %v3282_v7 = vpop.f32.mrf.mxu0  ;;  %v2113_v6 = vunpack.c.l.b16 %v2060_v49 }
  0xbf   : > { %v1744_v31 = vrot.slane %v1743_v46, 4 }
  0xc0   : > { %v3288_v57 = vpop.f32.mrf.mxu3  ;;  %v599_v14 = vpop.f32.mrf.mxu1  ;;  %v2128_v28 = vpack.c.b16 %v2113_v6, %v2112_v3  ;;  %v2066_v3 = vrot.slane %v3312_v59, 5 }
  0xc1   : > { %2544 = vmatmul.msk.bf16.gmra.mxu0 %vm445_vm3, %v1235_v16  ;;  %v600_v61 = vadd.f32 %v599_v14, %v3234_v52  ;;  %v1372_v52 = vrot.slane %v3069_v11, 5  ;;  %v1370_v16 = vsel %vm3014_vm7, %v2554_v39, %v1369_v30  ;;  %v1753_v14 = vor.u32 %v1752_v55, %v1748_v54  ;;  %v2635_v30 = vld [vmem:[%s2878_s7 + $0x30] sm:$0xf] }
  0xc2   : > { %v1420_v26 = vunpack.c.l.b16 %v1370_v16  ;;  %v1761_v47 = vshrl.u32 %v2635_v30, 16  ;;  %v1764_v48 = vshll.u32 %v2635_v30, 16  ;;  %v1379_v55 = vrot.slane %v3102_v34, 5 }
  0xc3   : > { %2562 = vmatmul.msk.bf16.vlgmr.msra.gmra.mxu1 %vm445_vm3, %v1434_v9  ;;  %v1373_v60 = vsel %vm3014_vm7, %v1371_v37, %v1372_v52  ;;  %v1754_v39 = vrot.slane %v1753_v14, 4  ;;  %v2063_v37 = vrot.slane %v3286_v10, 5  ;;  %v2547_v10 = vld [vmem:[%s2878_s7 + $0x24] sm:$0xe] }
  0xc4   : > { %v3301_v4 = vpop.f32.mrf.mxu2  ;;  %v1421_v22 = vunpack.c.l.b16 %v1373_v60  ;;  %v1749_v60 = vsel %vm2906_vm4, %v1744_v31, %v1748_v54  ;;  %v1763_v6 = vrot.slane %v1761_v47, 4  ;;  %v1766_v46 = vrot.slane %v1764_v48, 5 }
  0xc5   : > { %v2065_v62 = vrot.slane %v2063_v37, 4  ;;  %v1772_v54 = vrot.slane %v1770_v20, 5  ;;  %v1908_v30 = vunpack.c.l.b16 %v1749_v60 }
  0xc6   : > { %v3309_v15 = vpop.f32.mrf.mxu0  ;;  %v1435_v52 = vpack.c.b16 %v1421_v22, %v1420_v26  ;;  %v1378_v26 = vrot.slane %v1376_v12, 4 }
  0xc7   : > { %v2067_v31 = vsel %vm3014_vm7, %v2065_v62, %v2066_v3  ;;  %v2664_v3 = vld [vmem:[%s2878_s7 + $0x30] sm:$0xe] }
  0xc8   : > { %v3314_v25 = vpop.f32.mrf.mxu3  ;;  %v601_v11 = vpop.f32.mrf.mxu1 }
  0xc9   : > { %2621 = vmatmul.msk.bf16.vlgmr.msra.gmra.mxu2 %vm445_vm3, %v2706_v32  ;;  %v602_v9 = vadd.f32 %v601_v11, %v3260_v27  ;;  %v1758_v27 = vrot.slane %v1756_v51, 5  ;;  %v2671_v32 = vrot.slane %v2663_v24, 9  ;;  %v2555_v51 = vrot.slane %v2547_v10, 9  ;;  %v2707_v24 = vld [vmem:[%s2878_s7 + $0x24] sm:$0xff] }
  0xcb   : > { %v2064_v34 = vsel %vm3014_vm7, %v2671_v32, %v2063_v37  ;;  %v1380_v32 = vsel %vm3014_vm7, %v1378_v26, %v1379_v55 }
  0xcc   : > { %v784_v23 = vpop.f32.mrf.mxu2 }
  0xcd   : > { %2654 = vmatmul.msk.bf16.vlgmr.msra.gmra.mxu3 %vm445_vm3, %v1922_v0  ;;  %v824_v56 = vadd.f32 %v784_v23, %v600_v61  ;;  %v1774_v61 = vshrl.u32 %v3327_v40, 16  ;;  %v1759_v0 = vsel %vm2906_vm4, %v1754_v39, %v1758_v27  ;;  %v2114_v39 = vunpack.c.l.b16 %v2064_v34 }
  0xce   : > { %v1272_v2 = vpop.f32.mrf.mxu0  ;;  %v1767_v27 = vor.u32 %v1766_v46, %v1763_v6  ;;  %v2070_v46 = vrot.slane %v3327_v40, 5 }
  0xcf   : > { %v1776_v22 = vrot.slane %v1774_v61, 4 }
  0xd0   : > { %v938_v45 = vpop.f32.mrf.mxu3  ;;  %v604_v49 = vpop.f32.mrf.mxu1 }
  0xd1   : > { %2679 = vmatmul.msk.bf16.vlgmr.msra.gmra.mxu0 %vm445_vm3, %v2128_v28  ;;  %v978_v11 = vadd.f32 %v938_v45, %v824_v56  ;;  %v605_v16 = vadd.f32 %v604_v49, %v3282_v7  ;;  %v1909_v28 = vunpack.c.l.b16 %v1759_v0  ;;  %v3349_v56 = vld [vmem:[%s2878_s7 + $0x38] sm:$0x1]  ;;  %v2115_v49 = vunpack.c.l.b16 %v2067_v31 }
  0xd2   : > { %v1780_v47 = vshll.u32 %v3349_v56, 16 }
  0xd3   : > { %2563 = vmatmul.msk.bf16.gmra.mxu1 %vm445_vm3, %v1435_v52  ;;  %v3345_v7 = vadd.f32 %v1272_v2, %v978_v11  ;;  %v1377_v52 = vsel %vm3014_vm7, %v2555_v51, %v1376_v12  ;;  %v1923_v45 = vpack.c.b16 %v1909_v28, %v1908_v30  ;;  %v1423_v11 = vunpack.c.l.b16 %v1380_v32  ;;  %v3367_v51 = vld [vmem:[%s2878_s7 + $0x40] sm:$0xf] }
  0xd4   : > { %v786_v14 = vpop.f32.mrf.mxu2  ;;  %v1422_v61 = vunpack.c.l.b16 %v1377_v52  ;;  %v1768_v12 = vrot.slane %v1767_v27, 4  ;;  %v1782_v0 = vrot.slane %v1780_v47, 5  ;;  %v2129_v55 = vpack.c.b16 %v2115_v49, %v2114_v39  ;;  %v2708_v49 = vld [vmem:[%s2878_s7 + $0x30] sm:$0xff] }
  0xd5   : > { %v825_v23 = vadd.f32 %v786_v14, %v602_v9  ;;  %v1777_v9 = vor.u32 %v1776_v22, %v1772_v54  ;;  %v2638_v14 = vld [vmem:[%s2878_s7 + $0x3c] sm:$0xf]  ;;  %v1383_v30 = vrot.slane %v3110_v44, 5  ;;  %v2072_v27 = vrot.slane %v2070_v46, 4 }
  0xd6   : > { %v1274_v59 = vpop.f32.mrf.mxu0  ;;  %v1785_v31 = vshrl.u32 %v2638_v14, 16  ;;  %v1788_v39 = vshll.u32 %v2638_v14, 16  ;;  %v1386_v52 = vrot.slane %v3122_v63, 5 }
  0xd7   : > { %v1778_v60 = vrot.slane %v1777_v9, 4 }
  0xd8   : > { %v940_v37 = vpop.f32.mrf.mxu3  ;;  %v606_v2 = vpop.f32.mrf.mxu1 }
  0xd9   : > { %v979_v48 = vadd.f32 %v940_v37, %v825_v23  ;;  %2622 = vmatmul.msk.bf16.gmra.mxu2 %vm445_vm3, %v2707_v24  ;;  %v607_v20 = vadd.f32 %v606_v2, %v3309_v15  ;;  %v1436_v15 = vpack.c.b16 %v1423_v11, %v1422_v61  ;;  %v1773_v23 = vsel %vm2906_vm4, %v1768_v12, %v1772_v54 }
  0xda   : > { %v1783_v24 = vsel %vm2906_vm4, %v1778_v60, %v1782_v0  ;;  %v2073_v37 = vrot.slane %v3349_v56, 5  ;;  %v1794_v54 = vshll.u32 %v3367_v51, 16  ;;  %v1798_v2 = vshrl.u32 %v3367_v51, 16  ;;  %v2640_v0 = vld [vmem:[%s2878_s7 + $0x44] sm:$0x1] }
  0xdb   : > { %v3362_v34 = vadd.f32 %v1274_v59, %v979_v48  ;;  %v2548_v59 = vld [vmem:[%s2878_s7 + $0x30] sm:$0xe]  ;;  %v1911_v9 = vunpack.c.l.b16 %v1783_v24  ;;  %v1385_v48 = vrot.slane %v1383_v30, 4  ;;  %v1787_v61 = vrot.slane %v1785_v31, 4  ;;  %v2665_v31 = vld [vmem:[%s2878_s7 + $0x3c] sm:$0xe] }
  0xdc   : > { %v789_v10 = vpop.f32.mrf.mxu2  ;;  %v2556_v47 = vrot.slane %v2548_v59, 9  ;;  %v1790_v11 = vrot.slane %v1788_v39, 5  ;;  %v2074_v63 = vsel %vm3014_vm7, %v2072_v27, %v2073_v37  ;;  %v1796_v12 = vrot.slane %v1794_v54, 5 }
  0xdd   : > { %2655 = vmatmul.msk.bf16.gmra.mxu3 %vm445_vm3, %v1923_v45  ;;  %v826_v62 = vadd.f32 %v789_v10, %v605_v16  ;;  %v2672_v16 = vrot.slane %v2664_v3, 9  ;;  %v1800_v60 = vrot.slane %v1798_v2, 4  ;;  %v1804_v24 = vshll.u32 %v2640_v0, 16  ;;  %v3401_v2 = vld [vmem:[%s2878_s7 + $0x4c] sm:$0xf] }
  0xde   : > { %v1277_v6 = vpop.f32.mrf.mxu0 }
  0xdf   : > { %v2071_v56 = vsel %vm3014_vm7, %v2672_v16, %v2070_v46  ;;  %v1387_v46 = vsel %vm3014_vm7, %v1385_v48, %v1386_v52  ;;  %v2077_v16 = vrot.slane %v3367_v51, 5  ;;  %v2080_v48 = vrot.slane %v2640_v0, 5 }
  0xe0   : > { %v943_v26 = vpop.f32.mrf.mxu3  ;;  %v609_v22 = vpop.f32.mrf.mxu1  ;;  %v2116_v3 = vunpack.c.l.b16 %v2071_v56  ;;  %v1425_v59 = vunpack.c.l.b16 %v1387_v46 }
  0xe1   : > { %2680 = vmatmul.msk.bf16.gmra.mxu0 %vm445_vm3, %v2129_v55  ;;  %v980_v28 = vadd.f32 %v943_v26, %v826_v62  ;;  %v610_v40 = vadd.f32 %v609_v22, %v3202_v5  ;;  %v1910_v5 = vunpack.c.l.b16 %v1773_v23  ;;  %v1791_v22 = vor.u32 %v1790_v11, %v1787_v61 }
  0xe2   : > { %v1801_v23 = vor.u32 %v1800_v60, %v1796_v12  ;;  %v2079_v51 = vrot.slane %v2077_v16, 4  ;;  %v1390_v11 = vrot.slane %v3130_v13, 5 }
  0xe3   : > { %2564 = vmatmul.msk.bf16.gmra.mxu1 %vm445_vm3, %v1436_v15  ;;  %v3382_v44 = vadd.f32 %v1277_v6, %v980_v28  ;;  %v1924_v62 = vpack.c.b16 %v1911_v9, %v1910_v5  ;;  %v2117_v15 = vunpack.c.l.b16 %v2074_v63  ;;  %v1792_v54 = vrot.slane %v1791_v22, 4 }
  0xe4   : > { %v791_v32 = vpop.f32.mrf.mxu2  ;;  %v1806_v5 = vrot.slane %v1804_v24, 5  ;;  %v2673_v9 = vrot.slane %v2665_v31, 9  ;;  %v1822_v63 = vshrl.u32 %v3401_v2, 16  ;;  %v2709_v24 = vld [vmem:[%s2878_s7 + $0x3c] sm:$0xff]  ;;  %v3427_v31 = vld [vmem:[%s2878_s7 + $0x50] sm:$0x1] }
  0xe5   : > { %v827_v45 = vadd.f32 %v791_v32, %v607_v20  ;;  %v1384_v20 = vsel %vm3014_vm7, %v2556_v47, %v1383_v30  ;;  %v2641_v30 = vld [vmem:[%s2878_s7 + $0x48] sm:$0xf]  ;;  %v2130_v27 = vpack.c.b16 %v2117_v15, %v2116_v3  ;;  %v1802_v32 = vrot.slane %v1801_v23, 4 }
  0xe6   : > { %v1279_v10 = vpop.f32.mrf.mxu0  ;;  %v1424_v28 = vunpack.c.l.b16 %v1384_v20  ;;  %v1797_v0 = vsel %vm2906_vm4, %v1792_v54, %v1796_v12  ;;  %v2078_v13 = vsel %vm3014_vm7, %v2673_v9, %v2077_v16  ;;  %v1392_v15 = vrot.slane %v1390_v11, 4 }
  0xe7   : > { %v1807_v3 = vsel %vm2906_vm4, %v1802_v32, %v1806_v5  ;;  %v1824_v22 = vrot.slane %v1822_v63, 4 }
  0xe8   : > { %v945_v55 = vpop.f32.mrf.mxu3  ;;  %v611_v6 = vpop.f32.mrf.mxu1  ;;  %v1437_v47 = vpack.c.b16 %v1425_v59, %v1424_v28  ;;  %v1912_v28 = vunpack.c.l.b16 %v1797_v0  ;;  %v1913_v16 = vunpack.c.l.b16 %v1807_v3  ;;  %v2084_v0 = vrot.slane %v3401_v2, 5 }
  0xe9   : > { %v981_v14 = vadd.f32 %v945_v55, %v827_v45  ;;  %2623 = vmatmul.msk.bf16.gmra.mxu2 %vm445_vm3, %v2708_v49  ;;  %v612_v26 = vadd.f32 %v611_v6, %v3221_v29  ;;  %v1809_v45 = vshrl.u32 %v2641_v30, 16  ;;  %v1812_v49 = vshll.u32 %v2641_v30, 16  ;;  %v2549_v55 = vld [vmem:[%s2878_s7 + $0x3c] sm:$0xe] }
  0xea   : > { %v2081_v6 = vsel %vm3014_vm7, %v2079_v51, %v2080_v48  ;;  %v1925_v9 = vpack.c.b16 %v1913_v16, %v1912_v28  ;;  %v2086_v28 = vrot.slane %v2084_v0, 4  ;;  %v2087_v16 = vrot.slane %v3427_v31, 5 }
  0xeb   : > { %v3403_v52 = vadd.f32 %v1279_v10, %v981_v14  ;;  %v1814_v20 = vrot.slane %v1812_v49, 5  ;;  %v2557_v14 = vrot.slane %v2549_v55, 9  ;;  %v2119_v30 = vunpack.c.l.b16 %v2081_v6  ;;  %v2644_v49 = vld [vmem:[%s2878_s7 + $0x54] sm:$0xf] }
  0xec   : > { %v794_v39 = vpop.f32.mrf.mxu2  ;;  %v1836_v6 = vshll.u32 %v2644_v49, 16 }
  0xed   : > { %2656 = vmatmul.msk.bf16.gmra.mxu3 %vm445_vm3, %v1924_v62  ;;  %v828_v37 = vadd.f32 %v794_v39, %v610_v40  ;;  %v1818_v40 = vshll.u32 %v3401_v2, 16  ;;  %v1393_v62 = vrot.slane %v3145_v43, 5  ;;  %v2118_v39 = vunpack.c.l.b16 %v2078_v13 }
  0xee   : > { %v1282_v29 = vpop.f32.mrf.mxu0  ;;  %v1391_v54 = vsel %vm3014_vm7, %v2557_v14, %v1390_v11  ;;  %v1833_v13 = vshrl.u32 %v2644_v49, 16  ;;  %v1397_v2 = vrot.slane %v3158_v58, 5  ;;  %v1400_v58 = vrot.slane %v3172_v18, 5 }
  0xef   : > { %v3423_v12 = vrot.slane %v1818_v40, 5  ;;  %v1426_v48 = vunpack.c.l.b16 %v1391_v54  ;;  %v2088_v49 = vsel %vm3014_vm7, %v2086_v28, %v2087_v16  ;;  %v2647_v28 = vld [vmem:[%s2878_s7 + $0x60] sm:$0xf] }
  0xf0   : > { %v948_v56 = vpop.f32.mrf.mxu3  ;;  %v614_v61 = vpop.f32.mrf.mxu1 }
  0xf1   : > { %2681 = vmatmul.msk.bf16.gmra.mxu0 %vm445_vm3, %v2130_v27  ;;  %v982_v10 = vadd.f32 %v948_v56, %v828_v37  ;;  %v615_v60 = vadd.f32 %v614_v61, %v3249_v35  ;;  %v1811_v35 = vrot.slane %v1809_v45, 4  ;;  %v3439_v56 = vld [vmem:[%s2878_s7 + $0x58] sm:$0xf]  ;;  %v2131_v61 = vpack.c.b16 %v2119_v30, %v2118_v39 }
  0xf2   : > { %v1835_v39 = vrot.slane %v1833_v13, 4  ;;  %v1838_v30 = vrot.slane %v1836_v6, 5 }
  0xf3   : > { %2565 = vmatmul.msk.bf16.gmra.mxu1 %vm445_vm3, %v1437_v47  ;;  %v3421_v46 = vadd.f32 %v1282_v29, %v982_v10  ;;  %v1394_v29 = vsel %vm3014_vm7, %v1392_v15, %v1393_v62  ;;  %v1815_v32 = vor.u32 %v1814_v20, %v1811_v35  ;;  %v1828_v47 = vshll.u32 %v3427_v31, 16  ;;  %v2666_v62 = vld [vmem:[%s2878_s7 + $0x48] sm:$0xe] }
  0xf4   : > { %v796_v43 = vpop.f32.mrf.mxu2  ;;  %v1427_v45 = vunpack.c.l.b16 %v1394_v29  ;;  %v1842_v35 = vshll.u32 %v3439_v56, 16  ;;  %v1846_v20 = vshrl.u32 %v3439_v56, 16 }
  0xf5   : > { %v829_v23 = vadd.f32 %v796_v43, %v612_v26  ;;  %v1825_v26 = vor.u32 %v1824_v22, %v3423_v12  ;;  %v1816_v40 = vrot.slane %v1815_v32, 4  ;;  %v1830_v55 = vrot.slane %v1828_v47, 5 }
  0xf6   : > { %v1284_v59 = vpop.f32.mrf.mxu0  ;;  %v1438_v43 = vpack.c.b16 %v1427_v45, %v1426_v48  ;;  %v2674_v22 = vrot.slane %v2666_v62, 9  ;;  %v1399_v32 = vrot.slane %v1397_v2, 4 }
  0xf7   : > { %v1826_v63 = vrot.slane %v1825_v26, 4  ;;  %v3462_v26 = vld [vmem:[%s2878_s7 + $0x5c] sm:$0x1] }
  0xf8   : > { %v950_v27 = vpop.f32.mrf.mxu3  ;;  %v616_v37 = vpop.f32.mrf.mxu1  ;;  %v2085_v45 = vsel %vm3014_vm7, %v2674_v22, %v2084_v0  ;;  %v1852_v18 = vshll.u32 %v3462_v26, 16  ;;  %v2667_v22 = vld [vmem:[%s2878_s7 + $0x54] sm:$0xe] }
  0xf9   : > { %v983_v5 = vadd.f32 %v950_v27, %v829_v23  ;;  %2624 = vmatmul.msk.bf16.gmra.mxu2 %vm445_vm3, %v2709_v24  ;;  %v617_v51 = vadd.f32 %v616_v37, %v3269_v19  ;;  %v1831_v24 = vsel %vm2906_vm4, %v1826_v63, %v1830_v55  ;;  %v1844_v27 = vrot.slane %v1842_v35, 5 }
  0xfa   : > { %v1848_v37 = vrot.slane %v1846_v20, 4  ;;  %v1915_v31 = vunpack.c.l.b16 %v1831_v24  ;;  %v2120_v0 = vunpack.c.l.b16 %v2085_v45  ;;  %v1407_v45 = vrot.slane %v3199_v1, 5 }
  0xfb   : > { %v3444_v3 = vadd.f32 %v1284_v59, %v983_v5  ;;  %v2550_v59 = vld [vmem:[%s2878_s7 + $0x48] sm:$0xe] }
  0xfc   : > { %v799_v11 = vpop.f32.mrf.mxu2  ;;  %v2558_v29 = vrot.slane %v2550_v59, 9 }
  0xfd   : > { %2657 = vmatmul.msk.bf16.gmra.mxu3 %vm445_vm3, %v1925_v9  ;;  %v830_v10 = vadd.f32 %v799_v11, %v615_v60  ;;  %v1821_v60 = vsel %vm2906_vm4, %v1816_v40, %v3423_v12  ;;  %v2710_v9 = vld [vmem:[%s2878_s7 + $0x48] sm:$0xff]  ;;  %v1849_v11 = vor.u32 %v1848_v37, %v1844_v27  ;;  %v2675_v37 = vrot.slane %v2667_v22, 9 }
  0xfe   : > { %v1287_v19 = vpop.f32.mrf.mxu0  ;;  %v1914_v47 = vunpack.c.l.b16 %v1821_v60 }
  0xff   : > { %v1850_v6 = vrot.slane %v1849_v11, 4 }
 0x100   : > { %v953_v14 = vpop.f32.mrf.mxu3  ;;  %v619_v15 = vpop.f32.mrf.mxu1  ;;  %v1926_v62 = vpack.c.b16 %v1915_v31, %v1914_v47  ;;  %v2094_v47 = vrot.slane %v3462_v26, 5  ;;  %v2551_v31 = vld [vmem:[%s2878_s7 + $0x54] sm:$0xe] }
 0x101   : > { %2682 = vmatmul.msk.bf16.gmra.mxu0 %vm445_vm3, %v2131_v61  ;;  %v984_v23 = vadd.f32 %v953_v14, %v830_v10  ;;  %v1839_v61 = vor.u32 %v1838_v30, %v1835_v39  ;;  %v1401_v10 = vsel %vm3014_vm7, %v1399_v32, %v1400_v58  ;;  %v620_v35 = vadd.f32 %v619_v15, %v3226_v41  ;;  %v3483_v39 = vld [vmem:[%s2878_s7 + $0x64] sm:$0xf] }
 0x102   : > { %v1854_v14 = vrot.slane %v1852_v18, 5  ;;  %v1857_v32 = vshrl.u32 %v2647_v28, 16 }
 0x103   : > { %2566 = vmatmul.msk.bf16.gmra.mxu1 %vm445_vm3, %v1438_v43  ;;  %v3458_v12 = vadd.f32 %v1287_v19, %v984_v23  ;;  %v2121_v19 = vunpack.c.l.b16 %v2088_v49  ;;  %v1840_v13 = vrot.slane %v1839_v61, 4  ;;  %v1429_v43 = vunpack.c.l.b16 %v1401_v10 }
 0x104   : > { %v801_v54 = vpop.f32.mrf.mxu2  ;;  %v1855_v15 = vsel %vm2906_vm4, %v1850_v6, %v1854_v14  ;;  %v1859_v10 = vrot.slane %v1857_v32, 4 }
 0x105   : > { %v831_v5 = vadd.f32 %v801_v54, %v617_v51  ;;  %v1398_v51 = vsel %vm3014_vm7, %v2558_v29, %v1397_v2  ;;  %v2091_v2 = vrot.slane %v3439_v56, 5  ;;  %v2132_v23 = vpack.c.b16 %v2121_v19, %v2120_v0  ;;  %v2711_v0 = vld [vmem:[%s2878_s7 + $0x54] sm:$0xff] }
 0x106   : > { %v1289_v48 = vpop.f32.mrf.mxu0  ;;  %v1428_v20 = vunpack.c.l.b16 %v1398_v51  ;;  %v1845_v41 = vsel %vm2906_vm4, %v1840_v13, %v1844_v27  ;;  %v1404_v29 = vrot.slane %v3184_v42, 5  ;;  %v1866_v27 = vshll.u32 %v3483_v39, 16  ;;  %v2649_v13 = vld [vmem:[%s2878_s7 + $0x68] sm:$0x1] }
 0x107   : > { %v2093_v54 = vrot.slane %v2091_v2, 4  ;;  %v1916_v49 = vunpack.c.l.b16 %v1845_v41  ;;  %v1917_v42 = vunpack.c.l.b16 %v1855_v15  ;;  %v2092_v11 = vsel %vm3014_vm7, %v2675_v37, %v2091_v2 }
 0x108   : > { %v955_v40 = vpop.f32.mrf.mxu3  ;;  %v621_v63 = vpop.f32.mrf.mxu1  ;;  %v1439_v30 = vpack.c.b16 %v1429_v43, %v1428_v20  ;;  %v1406_v51 = vrot.slane %v1404_v29, 4  ;;  %v2122_v6 = vunpack.c.l.b16 %v2092_v11 }
 0x109   : > { %v985_v55 = vadd.f32 %v955_v40, %v831_v5  ;;  %2625 = vmatmul.msk.bf16.gmra.mxu2 %vm445_vm3, %v2710_v9  ;;  %v1860_v5 = vshll.u32 %v2647_v28, 16  ;;  %v622_v61 = vadd.f32 %v621_v63, %v3256_v17  ;;  %v2559_v40 = vrot.slane %v2551_v31, 9 }
 0x10a   : > { %v2095_v1 = vsel %vm3014_vm7, %v2093_v54, %v2094_v47  ;;  %v1868_v17 = vrot.slane %v1866_v27, 5  ;;  %v1876_v28 = vshll.u32 %v2649_v13, 16  ;;  %v2098_v31 = vrot.slane %v3483_v39, 5  ;;  %v2650_v27 = vld [vmem:[%s2878_s7 + $0x6c] sm:$0xf] }
 0x10b   : > { %v3480_v16 = vadd.f32 %v1289_v48, %v985_v55  ;;  %v1870_v48 = vshrl.u32 %v3483_v39, 16  ;;  %v1862_v55 = vrot.slane %v1860_v5, 5  ;;  %v2123_v20 = vunpack.c.l.b16 %v2095_v1  ;;  %v2668_v5 = vld [vmem:[%s2878_s7 + $0x60] sm:$0xe] }
 0x10c   : > { %v804_v60 = vpop.f32.mrf.mxu2  ;;  %v1405_v14 = vsel %vm3014_vm7, %v2559_v40, %v1404_v29  ;;  %v1878_v32 = vrot.slane %v1876_v28, 5  ;;  %v2552_v40 = vld [vmem:[%s2878_s7 + $0x60] sm:$0xe]  ;;  %v1881_v39 = vshrl.u32 %v2650_v27, 16  ;;  %v1414_v1 = vrot.slane %v3232_v50, 5 }
 0x10d   : > { %2658 = vmatmul.msk.bf16.gmra.mxu3 %vm445_vm3, %v1926_v62  ;;  %v832_v24 = vadd.f32 %v804_v60, %v620_v35  ;;  %v1872_v63 = vrot.slane %v1870_v48, 4  ;;  %v1408_v60 = vsel %vm3014_vm7, %v1406_v51, %v1407_v45  ;;  %v1863_v22 = vor.u32 %v1862_v55, %v1859_v10 }
 0x10e   : > { %v1292_v59 = vpop.f32.mrf.mxu0  ;;  %v1431_v41 = vunpack.c.l.b16 %v1408_v60  ;;  %v2133_v15 = vpack.c.b16 %v2123_v20, %v2122_v6  ;;  %v1884_v51 = vshll.u32 %v2650_v27, 16  ;;  %v2100_v10 = vrot.slane %v2098_v31, 4 }
 0x10f   : > { %v2101_v55 = vrot.slane %v2649_v13, 5  ;;  %v2712_v13 = vld [vmem:[%s2878_s7 + $0x60] sm:$0xff] }
 0x110   : > { %v958_v56 = vpop.f32.mrf.mxu3  ;;  %v624_v58 = vpop.f32.mrf.mxu1 }
 0x111   : > { %2683 = vmatmul.msk.bf16.gmra.mxu0 %vm445_vm3, %v2132_v23  ;;  %v986_v9 = vadd.f32 %v958_v56, %v832_v24  ;;  %v1927_v23 = vpack.c.b16 %v1917_v42, %v1916_v49  ;;  %v1873_v24 = vor.u32 %v1872_v63, %v1868_v17  ;;  %v1864_v56 = vrot.slane %v1863_v22, 4 }
 0x112   : > { %v1411_v42 = vrot.slane %v3213_v21, 5  ;;  %v1883_v22 = vrot.slane %v1881_v39, 4 }
 0x113   : > { %2567 = vmatmul.msk.bf16.gmra.mxu1 %vm445_vm3, %v1439_v30  ;;  %v3500_v18 = vadd.f32 %v1292_v59, %v986_v9  ;;  %v625_v59 = vadd.f32 %v624_v58, %v3277_v8  ;;  %v1430_v30 = vunpack.c.l.b16 %v1405_v14  ;;  %v1874_v29 = vrot.slane %v1873_v24, 4  ;;  %v3519_v58 = vld [vmem:[%s2878_s7 + $0x70] sm:$0xf]  ;;  %v2652_v24 = vld [vmem:[%s2878_s7 + $0x74] sm:$0x1] }
 0x114   : > { %v806_v26 = vpop.f32.mrf.mxu2  ;;  %v1869_v49 = vsel %vm2906_vm4, %v1864_v56, %v1868_v17  ;;  %v1413_v20 = vrot.slane %v1411_v42, 4  ;;  %v2105_v39 = vrot.slane %v3519_v58, 5 }
 0x115   : > { %v833_v62 = vadd.f32 %v806_v26, %v622_v61  ;;  %v1440_v8 = vpack.c.b16 %v1431_v41, %v1430_v30  ;;  %v2676_v61 = vrot.slane %v2668_v5, 9  ;;  %v1879_v26 = vsel %vm2906_vm4, %v1874_v29, %v1878_v32 }
 0x116   : > { %v1294_v19 = vpop.f32.mrf.mxu0  ;;  %v1919_v6 = vunpack.c.l.b16 %v1879_v26  ;;  %v1900_v5 = vshll.u32 %v2652_v24, 16 }
 0x117   : > { %v2099_v60 = vsel %vm3014_vm7, %v2676_v61, %v2098_v31 }
 0x118   : > { %v960_v35 = vpop.f32.mrf.mxu3  ;;  %v626_v43 = vpop.f32.mrf.mxu1 }
 0x119   : > { %v987_v2 = vadd.f32 %v960_v35, %v833_v62  ;;  %2626 = vmatmul.msk.bf16.gmra.mxu2 %vm445_vm3, %v2711_v0  ;;  %v1890_v62 = vshll.u32 %v3519_v58, 16  ;;  %v1894_v0 = vshrl.u32 %v3519_v58, 16  ;;  %v627_v21 = vadd.f32 %v626_v43, %v3301_v4 }
 0x11a   : > { %v2560_v35 = vrot.slane %v2552_v40, 9  ;;  %v2102_v4 = vsel %vm3014_vm7, %v2100_v10, %v2101_v55  ;;  %v1902_v40 = vrot.slane %v1900_v5, 5  ;;  %v2669_v10 = vld [vmem:[%s2878_s7 + $0x6c] sm:$0xe] }
 0x11b   : > { %v3514_v9 = vadd.f32 %v1294_v19, %v987_v2  ;;  %v1918_v19 = vunpack.c.l.b16 %v1869_v49  ;;  %v1886_v2 = vrot.slane %v1884_v51, 5  ;;  %v1892_v43 = vrot.slane %v1890_v62, 5 }
 0x11c   : > { %v809_v37 = vpop.f32.mrf.mxu2  ;;  %v1412_v41 = vsel %vm3014_vm7, %v2560_v35, %v1411_v42 }
 0x11d   : > { %2659 = vmatmul.msk.bf16.gmra.mxu3 %vm445_vm3, %v1927_v23  ;;  %v834_v54 = vadd.f32 %v809_v37, %v625_v59  ;;  %v1896_v23 = vrot.slane %v1894_v0, 4  ;;  %v2124_v59 = vunpack.c.l.b16 %v2099_v60  ;;  %v1928_v56 = vpack.c.b16 %v1919_v6, %v1918_v19 }
 0x11e   : > { %v1297_v47 = vpop.f32.mrf.mxu0  ;;  %v1887_v29 = vor.u32 %v1886_v2, %v1883_v22  ;;  %v1432_v31 = vunpack.c.l.b16 %v1412_v41 }
 0x11f   : > { %v1897_v32 = vor.u32 %v1896_v23, %v1892_v43 }
 0x120   : > { %v963_v48 = vpop.f32.mrf.mxu3  ;;  %v629_v45 = vpop.f32.mrf.mxu1  ;;  %v1888_v42 = vrot.slane %v1887_v29, 4 }
 0x121   : > { %2684 = vmatmul.msk.bf16.gmra.mxu0 %vm445_vm3, %v2133_v15  ;;  %v988_v11 = vadd.f32 %v963_v48, %v834_v54  ;;  %v1415_v15 = vsel %vm3014_vm7, %v1413_v20, %v1414_v1  ;;  %v2125_v54 = vunpack.c.l.b16 %v2102_v4  ;;  %v1898_v26 = vrot.slane %v1897_v32, 4  ;;  %v2713_v20 = vld [vmem:[%s2878_s7 + $0x6c] sm:$0xff] }
 0x122   : > { %v1433_v27 = vunpack.c.l.b16 %v1415_v15  ;;  %v1893_v62 = vsel %vm2906_vm4, %v1888_v42, %v1892_v43  ;;  %v2677_v1 = vrot.slane %v2669_v10, 9 }
 0x123   : > { %2568 = vmatmul.msk.bf16.gmra.mxu1 %vm445_vm3, %v1440_v8  ;;  %v3533_v17 = vadd.f32 %v1297_v47, %v988_v11  ;;  %v630_v47 = vadd.f32 %v629_v45, %v3236_v53  ;;  %v2134_v49 = vpack.c.b16 %v2125_v54, %v2124_v59  ;;  %v1903_v0 = vsel %vm2906_vm4, %v1898_v26, %v1902_v40 }
 0x124   : > { %v811_v63 = vpop.f32.mrf.mxu2  ;;  %v1441_v51 = vpack.c.b16 %v1433_v27, %v1432_v31  ;;  %v2106_v22 = vsel %vm3014_vm7, %v2677_v1, %v2105_v39 }
 0x125   : > { %v835_v14 = vadd.f32 %v811_v63, %v627_v21  ;;  %v2107_v21 = vrot.slane %v2105_v39, 4  ;;  %v2108_v63 = vrot.slane %v2652_v24, 5  ;;  %v2126_v43 = vunpack.c.l.b16 %v2106_v22  ;;  %v3583_v39 = vld [vmem:[%s3670_s2] ss:$0 sm:$0xff] }
 0x126   : > { %v1299_v50 = vpop.f32.mrf.mxu0 }
 0x127   : > { %v2109_v36 = vsel %vm3014_vm7, %v2107_v21, %v2108_v63 }
 0x128   : > { %v965_v28 = vpop.f32.mrf.mxu3  ;;  %v631_v30 = vpop.f32.mrf.mxu1  ;;  %v2127_v23 = vunpack.c.l.b16 %v2109_v36 }
 0x129   : > { %v989_v37 = vadd.f32 %v965_v28, %v835_v14  ;;  %2627 = vmatmul.msk.bf16.gmra.mxu2 %vm445_vm3, %v2712_v13  ;;  %v632_v19 = vadd.f32 %v631_v30, %v3262_v38  ;;  %v1920_v14 = vunpack.c.l.b16 %v1893_v62  ;;  %v1921_v13 = vunpack.c.l.b16 %v1903_v0 }
 0x12a   : > { %v2135_v30 = vpack.c.b16 %v2127_v23, %v2126_v43 }
 0x12b   : > { %v3547_v8 = vadd.f32 %v1299_v50, %v989_v37  ;;  %v1929_v38 = vpack.c.b16 %v1921_v13, %v1920_v14 }
 0x12c   : > { %v814_v48 = vpop.f32.mrf.mxu2 }
 0x12d   : > { %2660 = vmatmul.msk.bf16.gmra.mxu3 %vm445_vm3, %v1928_v56  ;;  %v836_v61 = vadd.f32 %v814_v48, %v630_v47 }
 0x12e   : > { %v1302_v11 = vpop.f32.mrf.mxu0 }
 0x130   : > { %v968_v55 = vpop.f32.mrf.mxu3  ;;  %v634_v53 = vpop.f32.mrf.mxu1 }
 0x131   : > { %2685 = vmatmul.msk.bf16.gmra.mxu0 %vm445_vm3, %v2134_v49  ;;  %v990_v45 = vadd.f32 %v968_v55, %v836_v61  ;;  %v635_v24 = vadd.f32 %v634_v53, %v3288_v57 }
 0x133   : > { %2569 = vmatmul.msk.bf16.gmra.mxu1 %vm445_vm3, %v1441_v51  ;;  %v3559_v58 = vadd.f32 %v1302_v11, %v990_v45 }
 0x134   : > { %v816_v6 = vpop.f32.mrf.mxu2 }
 0x135   : > { %v837_v35 = vadd.f32 %v816_v6, %v632_v19 }
 0x136   : > { %v1304_v60 = vpop.f32.mrf.mxu0 }
 0x138   : > { %v970_v2 = vpop.f32.mrf.mxu3  ;;  %v636_v50 = vpop.f32.mrf.mxu1 }
 0x139   : > { %v991_v4 = vadd.f32 %v970_v2, %v837_v35  ;;  %2628 = vmatmul.msk.bf16.gmra.mxu2 %vm445_vm3, %v2713_v20  ;;  %v637_v54 = vadd.f32 %v636_v50, %v3314_v25 }
 0x13b   : > { %v3568_v28 = vadd.f32 %v1304_v60, %v991_v4 }
 0x13c   : > { %v819_v59 = vpop.f32.mrf.mxu2 }
 0x13d   : > { %2661 = vmatmul.msk.bf16.gmra.mxu3 %vm445_vm3, %v1929_v38  ;;  %v838_v41 = vadd.f32 %v819_v59, %v635_v24 }
 0x13e   : > { %v1307_v33 = vpop.f32.mrf.mxu0 }
 0x140   : > { %v973_v15 = vpop.f32.mrf.mxu3  ;;  %v1478_v37 = vpop.f32.mrf.mxu1 }
 0x141   : > { %2686 = vmatmul.msk.bf16.gmra.mxu0 %vm445_vm3, %v2135_v30  ;;  %v992_v56 = vadd.f32 %v973_v15, %v838_v41  ;;  %v1518_v48 = vadd.f32 %v1478_v37, %v3345_v7 }
 0x143   : > { %v3573_v29 = vadd.f32 %v1307_v33, %v992_v56 }
 0x144   : > { %v821_v32 = vpop.f32.mrf.mxu2 }
 0x145   : > { %v839_v57 = vadd.f32 %v821_v32, %v637_v54 }
 0x146   : > { %v1309_v5 = vpop.f32.mrf.mxu0 }
 0x148   : > { %v975_v47 = vpop.f32.mrf.mxu3  ;;  %v1480_v31 = vpop.f32.mrf.mxu1 }
 0x149   : > { %v993_v27 = vadd.f32 %v975_v47, %v839_v57  ;;  %v1519_v7 = vadd.f32 %v1480_v31, %v3362_v34 }
 0x14b   : > { %v3577_v49 = vadd.f32 %v1309_v5, %v993_v27 }
 0x14c   : > { %v1632_v61 = vpop.f32.mrf.mxu2 }
 0x14d   : > { %v1672_v42 = vadd.f32 %v1632_v61, %v1518_v48 }
 0x14e   : > { %v2172_v11 = vpop.f32.mrf.mxu0 }
 0x150   : > { %v1966_v25 = vpop.f32.mrf.mxu3  ;;  %v1483_v26 = vpop.f32.mrf.mxu1 }
 0x151   : > { %v2006_v40 = vadd.f32 %v1966_v25, %v1672_v42  ;;  %v1520_v63 = vadd.f32 %v1483_v26, %v3382_v44 }
 0x153   : > { %v2212_v51 = vadd.f32 %v2172_v11, %v2006_v40 }
 0x154   : > { %v1634_v10 = vpop.f32.mrf.mxu2 }
 0x155   : > { %v2232_v55 = vadd.f32 %v3583_v39, %v2212_v51  ;;  %v1673_v53 = vadd.f32 %v1634_v10, %v1519_v7 }
 0x156   : > { %v2174_v45 = vpop.f32.mrf.mxu0 }
 0x157   : > { %v2248_v62 = vpack.c.bf16 %v2232_v55, %v2232_v55 }
 0x158   : > { %v1968_v0 = vpop.f32.mrf.mxu3  ;;  %v1485_v1 = vpop.f32.mrf.mxu1 }
 0x159   : > { %2265 = vst.msk [vmem:[%s3590_s29] sm:$0xf] %vm2264_vm8, %v2248_v62  ;;  %v2007_v21 = vadd.f32 %v1968_v0, %v1673_v53  ;;  %v1521_v2 = vadd.f32 %v1485_v1, %v3403_v52 }
 0x15b   : > { %v2213_v34 = vadd.f32 %v2174_v45, %v2007_v21 }
 0x15c   : > { %v1637_v19 = vpop.f32.mrf.mxu2 }
 0x15d   : > { %v2233_v6 = vadd.f32 %v3583_v39, %v2213_v34  ;;  %v1674_v35 = vadd.f32 %v1637_v19, %v1520_v63 }
 0x15e   : > { %v2177_v20 = vpop.f32.mrf.mxu0 }
 0x15f   : > { %v2249_v14 = vpack.c.bf16 %v2233_v6, %v2233_v6 }
 0x160   : > { %v1971_v13 = vpop.f32.mrf.mxu3  ;;  %v1488_v60 = vpop.f32.mrf.mxu1 }
 0x161   : > { %2266 = vst.msk [vmem:[%s3590_s29 + $0x4] sm:$0xf] %vm2264_vm8, %v2249_v14  ;;  %v2008_v22 = vadd.f32 %v1971_v13, %v1674_v35  ;;  %v1522_v41 = vadd.f32 %v1488_v60, %v3421_v46 }
 0x163   : > { %v2214_v36 = vadd.f32 %v2177_v20, %v2008_v22 }
 0x164   : > { %v1639_v50 = vpop.f32.mrf.mxu2 }
 0x165   : > { %v2234_v4 = vadd.f32 %v3583_v39, %v2214_v36  ;;  %v1675_v38 = vadd.f32 %v1639_v50, %v1521_v2 }
 0x166   : > { %v2179_v44 = vpop.f32.mrf.mxu0 }
 0x167   : > { %v2250_v43 = vpack.c.bf16 %v2234_v4, %v2234_v4 }
 0x168   : > { %v1973_v23 = vpop.f32.mrf.mxu3  ;;  %v1490_v24 = vpop.f32.mrf.mxu1 }
 0x169   : > { %2267 = vst.msk [vmem:[%s3590_s29 + $0x8] sm:$0xf] %vm2264_vm8, %v2250_v43  ;;  %v2009_v59 = vadd.f32 %v1973_v23, %v1675_v38  ;;  %v1523_v47 = vadd.f32 %v1490_v24, %v3444_v3 }
 0x16b   : > { %v2215_v30 = vadd.f32 %v2179_v44, %v2009_v59 }
 0x16c   : > { %v1642_v33 = vpop.f32.mrf.mxu2 }
 0x16d   : > { %v2235_v15 = vadd.f32 %v3583_v39, %v2215_v30  ;;  %v1676_v37 = vadd.f32 %v1642_v33, %v1522_v41 }
 0x16e   : > { %v2182_v52 = vpop.f32.mrf.mxu0 }
 0x16f   : > { %v2251_v56 = vpack.c.bf16 %v2235_v15, %v2235_v15 }
 0x170   : > { %v1976_v54 = vpop.f32.mrf.mxu3  ;;  %v1493_v32 = vpop.f32.mrf.mxu1 }
 0x171   : > { %2268 = vst.msk [vmem:[%s3590_s29 + $0xc] sm:$0xf] %vm2264_vm8, %v2251_v56  ;;  %v2010_v57 = vadd.f32 %v1976_v54, %v1676_v37  ;;  %v1524_v40 = vadd.f32 %v1493_v32, %v3458_v12 }
 0x173   : > { %v2216_v5 = vadd.f32 %v2182_v52, %v2010_v57 }
 0x174   : > { %v1644_v31 = vpop.f32.mrf.mxu2 }
 0x175   : > { %v2236_v27 = vadd.f32 %v3583_v39, %v2216_v5  ;;  %v1677_v48 = vadd.f32 %v1644_v31, %v1523_v47 }
 0x176   : > { %v2184_v46 = vpop.f32.mrf.mxu0 }
 0x177   : > { %v2252_v61 = vpack.c.bf16 %v2236_v27, %v2236_v27 }
 0x178   : > { %v1978_v42 = vpop.f32.mrf.mxu3  ;;  %v1495_v11 = vpop.f32.mrf.mxu1 }
 0x179   : > { %2269 = vst.msk [vmem:[%s3590_s29 + $0x10] sm:$0xf] %vm2264_vm8, %v2252_v61  ;;  %v2011_v25 = vadd.f32 %v1978_v42, %v1677_v48  ;;  %v1525_v1 = vadd.f32 %v1495_v11, %v3480_v16 }
 0x17b   : > { %v2217_v26 = vadd.f32 %v2184_v46, %v2011_v25 }
 0x17c   : > { %v1647_v51 = vpop.f32.mrf.mxu2 }
 0x17d   : > { %v2237_v7 = vadd.f32 %v3583_v39, %v2217_v26  ;;  %v1678_v10 = vadd.f32 %v1647_v51, %v1524_v40 }
 0x17e   : > { %v2187_v3 = vpop.f32.mrf.mxu0 }
 0x17f   : > { %v2253_v55 = vpack.c.bf16 %v2237_v7, %v2237_v7 }
 0x180   : > { %v1981_v53 = vpop.f32.mrf.mxu3  ;;  %v1498_v45 = vpop.f32.mrf.mxu1 }
 0x181   : > { %2270 = vst.msk [vmem:[%s3590_s29 + $0x14] sm:$0xf] %vm2264_vm8, %v2253_v55  ;;  %v2012_v62 = vadd.f32 %v1981_v53, %v1678_v10  ;;  %v1526_v13 = vadd.f32 %v1498_v45, %v3500_v18 }
 0x183   : > { %v2218_v0 = vadd.f32 %v2187_v3, %v2012_v62 }
 0x184   : > { %v1649_v21 = vpop.f32.mrf.mxu2 }
 0x185   : > { %v2238_v34 = vadd.f32 %v3583_v39, %v2218_v0  ;;  %v1679_v63 = vadd.f32 %v1649_v21, %v1525_v1 }
 0x186   : > { %v2189_v12 = vpop.f32.mrf.mxu0 }
 0x187   : > { %v2254_v19 = vpack.c.bf16 %v2238_v34, %v2238_v34 }
 0x188   : > { %v1983_v6 = vpop.f32.mrf.mxu3  ;;  %v1500_v35 = vpop.f32.mrf.mxu1 }
 0x189   : > { %2271 = vst.msk [vmem:[%s3590_s29 + $0x18] sm:$0xf] %vm2264_vm8, %v2254_v19  ;;  %v2013_v20 = vadd.f32 %v1983_v6, %v1679_v63  ;;  %v1527_v43 = vadd.f32 %v1500_v35, %v3514_v9 }
 0x18b   : > { %v2219_v14 = vadd.f32 %v2189_v12, %v2013_v20 }
 0x18c   : > { %v1652_v60 = vpop.f32.mrf.mxu2 }
 0x18d   : > { %v2239_v22 = vadd.f32 %v3583_v39, %v2219_v14  ;;  %v1680_v36 = vadd.f32 %v1652_v60, %v1526_v13 }
 0x18e   : > { %v2192_v16 = vpop.f32.mrf.mxu0 }
 0x18f   : > { %v2255_v2 = vpack.c.bf16 %v2239_v22, %v2239_v22 }
 0x190   : > { %v1986_v50 = vpop.f32.mrf.mxu3  ;;  %v1503_v4 = vpop.f32.mrf.mxu1 }
 0x191   : > { %2272 = vst.msk [vmem:[%s3590_s29 + $0x1c] sm:$0xf] %vm2264_vm8, %v2255_v2  ;;  %v2014_v38 = vadd.f32 %v1986_v50, %v1680_v36  ;;  %v1528_v52 = vadd.f32 %v1503_v4, %v3533_v17 }
 0x193   : > { %v2220_v44 = vadd.f32 %v2192_v16, %v2014_v38 }
 0x194   : > { %v1654_v23 = vpop.f32.mrf.mxu2 }
 0x195   : > { %v2240_v24 = vadd.f32 %v3583_v39, %v2220_v44  ;;  %v1681_v18 = vadd.f32 %v1654_v23, %v1527_v43 }
 0x196   : > { %v2194_v59 = vpop.f32.mrf.mxu0 }
 0x197   : > { %v2256_v30 = vpack.c.bf16 %v2240_v24, %v2240_v24 }
 0x198   : > { %v1988_v41 = vpop.f32.mrf.mxu3  ;;  %v1505_v33 = vpop.f32.mrf.mxu1 }
 0x199   : > { %2273 = vst.msk [vmem:[%s3590_s29 + $0x20] sm:$0xf] %vm2264_vm8, %v2256_v30  ;;  %v2015_v15 = vadd.f32 %v1988_v41, %v1681_v18  ;;  %v1529_v48 = vadd.f32 %v1505_v33, %v3547_v8 }
 0x19b   : > { %v2221_v37 = vadd.f32 %v2194_v59, %v2015_v15 }
 0x19c   : > { %v1657_v56 = vpop.f32.mrf.mxu2 }
 0x19d   : > { %v2241_v54 = vadd.f32 %v3583_v39, %v2221_v37  ;;  %v1682_v9 = vadd.f32 %v1657_v56, %v1528_v52 }
 0x19e   : > { %v2197_v32 = vpop.f32.mrf.mxu0 }
 0x19f   : > { %v2257_v57 = vpack.c.bf16 %v2241_v54, %v2241_v54 }
 0x1a0   : > { %v1991_v5 = vpop.f32.mrf.mxu3  ;;  %v1508_v31 = vpop.f32.mrf.mxu1 }
 0x1a1   : > { %2274 = vst.msk [vmem:[%s3590_s29 + $0x24] sm:$0xf] %vm2264_vm8, %v2257_v57  ;;  %v2016_v47 = vadd.f32 %v1991_v5, %v1682_v9  ;;  %v1530_v51 = vadd.f32 %v1508_v31, %v3559_v58 }
 0x1a3   : > { %v2222_v27 = vadd.f32 %v2197_v32, %v2016_v47 }
 0x1a4   : > { %v1659_v46 = vpop.f32.mrf.mxu2 }
 0x1a5   : > { %v2242_v61 = vadd.f32 %v3583_v39, %v2222_v27  ;;  %v1683_v17 = vadd.f32 %v1659_v46, %v1529_v48 }
 0x1a6   : > { %v2199_v42 = vpop.f32.mrf.mxu0 }
 0x1a7   : > { %v2258_v11 = vpack.c.bf16 %v2242_v61, %v2242_v61 }
 0x1a8   : > { %v1993_v25 = vpop.f32.mrf.mxu3  ;;  %v1510_v7 = vpop.f32.mrf.mxu1 }
 0x1a9   : > { %2275 = vst.msk [vmem:[%s3590_s29 + $0x28] sm:$0xf] %vm2264_vm8, %v2258_v11  ;;  %v2017_v26 = vadd.f32 %v1993_v25, %v1683_v17  ;;  %v1531_v1 = vadd.f32 %v1510_v7, %v3568_v28 }
 0x1ab   : > { %v2223_v40 = vadd.f32 %v2199_v42, %v2017_v26 }
 0x1ac   : > { %v1662_v10 = vpop.f32.mrf.mxu2 }
 0x1ad   : > { %v2243_v3 = vadd.f32 %v3583_v39, %v2223_v40  ;;  %v1684_v8 = vadd.f32 %v1662_v10, %v1530_v51 }
 0x1ae   : > { %v2202_v55 = vpop.f32.mrf.mxu0 }
 0x1af   : > { %v2259_v53 = vpack.c.bf16 %v2243_v3, %v2243_v3 }
 0x1b0   : > { %v1996_v45 = vpop.f32.mrf.mxu3  ;;  %v1513_v58 = vpop.f32.mrf.mxu1 }
 0x1b1   : > { %2276 = vst.msk [vmem:[%s3590_s29 + $0x2c] sm:$0xf] %vm2264_vm8, %v2259_v53  ;;  %v2018_v62 = vadd.f32 %v1996_v45, %v1684_v8  ;;  %v1532_v14 = vadd.f32 %v1513_v58, %v3573_v29 }
 0x1b3   : > { %v2224_v0 = vadd.f32 %v2202_v55, %v2018_v62 }
 0x1b4   : > { %v1664_v21 = vpop.f32.mrf.mxu2 }
 0x1b5   : > { %v2244_v34 = vadd.f32 %v3583_v39, %v2224_v0  ;;  %v1685_v63 = vadd.f32 %v1664_v21, %v1531_v1 }
 0x1b6   : > { %v2204_v12 = vpop.f32.mrf.mxu0 }
 0x1b7   : > { %v2260_v19 = vpack.c.bf16 %v2244_v34, %v2244_v34 }
 0x1b8   : > { %v1998_v6 = vpop.f32.mrf.mxu3  ;;  %v1515_v36 = vpop.f32.mrf.mxu1 }
 0x1b9   : > { %2277 = vst.msk [vmem:[%s3590_s29 + $0x30] sm:$0xf] %vm2264_vm8, %v2260_v19  ;;  %v2019_v35 = vadd.f32 %v1998_v6, %v1685_v63  ;;  %v1533_v38 = vadd.f32 %v1515_v36, %v3577_v49 }
 0x1bb   : > { %v2225_v20 = vadd.f32 %v2204_v12, %v2019_v35 }
 0x1bc   : > { %v1667_v13 = vpop.f32.mrf.mxu2 }
 0x1bd   : > { %v2245_v60 = vadd.f32 %v3583_v39, %v2225_v20  ;;  %v1686_v28 = vadd.f32 %v1667_v13, %v1532_v14 }
 0x1be   : > { %v2207_v16 = vpop.f32.mrf.mxu0 }
 0x1bf   : > { %v2261_v22 = vpack.c.bf16 %v2245_v60, %v2245_v60 }
 0x1c0   : > { %v2001_v2 = vpop.f32.mrf.mxu3 }
 0x1c1   : > { %2278 = vst.msk [vmem:[%s3590_s29 + $0x34] sm:$0xf] %vm2264_vm8, %v2261_v22  ;;  %v2020_v50 = vadd.f32 %v2001_v2, %v1686_v28 }
 0x1c3   : > { %v2226_v4 = vadd.f32 %v2207_v16, %v2020_v50 }
 0x1c4   : > { %v1669_v44 = vpop.f32.mrf.mxu2 }
 0x1c5   : > { %v2246_v43 = vadd.f32 %v3583_v39, %v2226_v4  ;;  %v1687_v29 = vadd.f32 %v1669_v44, %v1533_v38 }
 0x1c6   : > { %v2209_v59 = vpop.f32.mrf.mxu0 }
 0x1c7   : > { %v2262_v23 = vpack.c.bf16 %v2246_v43, %v2246_v43 }
 0x1c8   : > { %v2003_v24 = vpop.f32.mrf.mxu3 }
 0x1c9   : > { %2279 = vst.msk [vmem:[%s3590_s29 + $0x38] sm:$0xf] %vm2264_vm8, %v2262_v23  ;;  %v2021_v18 = vadd.f32 %v2003_v24, %v1687_v29 }
 0x1cb   : > { %v2227_v30 = vadd.f32 %v2209_v59, %v2021_v18 }
 0x1cd   : > { %v2247_v41 = vadd.f32 %v3583_v39, %v2227_v30 }
 0x1cf   : > { %v2263_v33 = vpack.c.bf16 %v2247_v41, %v2247_v41 }
 0x1d1   : > { %2280 = vst.msk [vmem:[%s3590_s29 + $0x3c] sm:$0xf] %vm2264_vm8, %v2263_v33 }
 0x1d2 PF: > { %s13_s16 = sadd.s32 1, %s2797_s16   ;;  %s3676_s12 = smov %s2789_s14 }
 0x1d3   : > { %p10_p7 = scmp.ge.s32.totalorder %s13_s16, 6   ;;  %s3677_s13 = smov %s2793_s15 }
 0x1d4   : > { %s3678_s14 = smov %s3681_s17  ;;  %s3679_s15 = smov %s3685_s18 }
 0x1d5   :  { %12 = sbr.rel (!%p10_p7) target bundleno = 3 (0x3), region = 73 }

</bundles_post_ra>
